<compile_context>
chip_gen: v7x
topology: tpu7x:2x2x1
jax: 0.10.0
libtpu: 0.0.40
codegen_flags: <defaults>
</compile_context>

<pallas_src>
import functools

import jax
import jax.numpy as jnp
from jax import lax
from jax.experimental import pallas as pl
from jax.experimental.pallas import tpu as pltpu

LANE = 128
NEG_BIG = -1e30


def _round_up(x, m):
    return ((x + m - 1) // m) * m


def _node_tiles(n):
    """Node-dim padding and (row tile, reduction tile) sizes."""
    if n <= 512:
        np_ = _round_up(n, LANE)
        return np_, np_, np_
    np_ = _round_up(n, 512)
    return np_, 256, 512


# ---------------------------------------------------------------------------
# Kernel 1: GCNConv (aggr='mean')
#   H[i_tile] = (sum_k A1[i_tile, k_tile] @ X[k_tile]) @ W1^T + b1
# Grid: (row tiles : parallel, column/reduction tiles : arbitrary)
# ---------------------------------------------------------------------------
def gcn_kernel(a1_ref, x_ref, w1t_ref, b1_ref, h_ref, acc_ref):
    k = pl.program_id(1)

    @pl.when(k == 0)
    def _():
        acc_ref[...] = jnp.zeros_like(acc_ref)

    # bf16 x bf16 -> f32 accumulation on the MXU.
    acc_ref[...] += jnp.dot(a1_ref[...], x_ref[...],
                            preferred_element_type=jnp.float32)

    @pl.when(k == pl.num_programs(1) - 1)
    def _():
        # Weight GEMM applied once per output row tile.
        h_ref[...] = (
            jnp.dot(acc_ref[...].astype(jnp.bfloat16), w1t_ref[...],
                    preferred_element_type=jnp.float32)
            + b1_ref[...])


# ---------------------------------------------------------------------------
# Kernel 2: SAGEConv (aggr='mean') + log_softmax
#   Z[i_tile] = [ (A2 @ H)[i_tile] | H[i_tile] ] @ [Wl^T ; Wr^T] + b2
#   out = log_softmax over the first `num_classes` (real) lanes
# ---------------------------------------------------------------------------
def sage_kernel(a2_ref, hcol_ref, hrow_ref, wcat_ref, b2_ref, out_ref,
                acc_ref, *, num_classes):
    k = pl.program_id(1)

    @pl.when(k == 0)
    def _():
        acc_ref[...] = jnp.zeros_like(acc_ref)

    acc_ref[...] += jnp.dot(a2_ref[...], hcol_ref[...].astype(jnp.bfloat16),
                            preferred_element_type=jnp.float32)

    @pl.when(k == pl.num_programs(1) - 1)
    def _():
        # Fused single GEMM for the two SAGE terms (neighbor-mean | root).
        feats = jnp.concatenate([acc_ref[...], hrow_ref[...]], axis=1)
        z = (jnp.dot(feats.astype(jnp.bfloat16), wcat_ref[...],
                     preferred_element_type=jnp.float32)
             + b2_ref[...])

        # Masked log-softmax over the real class lanes (C <= Cp, lane-dense).
        col = lax.broadcasted_iota(jnp.int32, z.shape, 1)
        valid = col < num_classes
        zm = jnp.where(valid, z, NEG_BIG)
        m = jnp.max(zm, axis=1, keepdims=True)
        e = jnp.where(valid, jnp.exp(zm - m), 0.0)
        lse = jnp.log(jnp.sum(e, axis=1, keepdims=True)) + m
        out_ref[...] = z - lse   # padded lanes hold garbage; sliced off outside


@functools.partial(jax.jit, static_argnums=(7, 8))
def sage_forward(a1p, a2p, xp, w1t, b1p, wcat, b2p, n_real, c_real):
    """All operands pre-padded / pre-cast (see prepare_* helpers).
    a1p/a2p: [Np,Np] bf16; xp: [Np,Fp] bf16; w1t: [Fp,Hp] bf16; b1p: [1,Hp] f32;
    wcat: [2*Hp,Cp] bf16; b2p: [1,Cp] f32. Returns [n_real, c_real] f32."""
    Np = a1p.shape[0]
    Fp = xp.shape[1]
    Hp = w1t.shape[1]
    Cp = wcat.shape[1]

    tm = Np if Np <= 512 else 256     # row tile (parallel axis)
    tk = Np if Np <= 512 else 512     # reduction tile over A columns
    grid = (Np // tm, Np // tk)

    cparams = pltpu.CompilerParams(
        dimension_semantics=("parallel", "arbitrary"),
        vmem_limit_bytes=64 * 1024 * 1024,
    )

    # ---- Layer 1: H = (A1 @ X) @ W1^T + b1 --------------------------------
    h = pl.pallas_call(
        gcn_kernel,
        out_shape=jax.ShapeDtypeStruct((Np, Hp), jnp.float32),
        grid=grid,
        in_specs=[
            pl.BlockSpec((tm, tk), lambda i, k: (i, k)),      # A1
            pl.BlockSpec((tk, Fp), lambda i, k: (k, 0)),      # X
            pl.BlockSpec((Fp, Hp), lambda i, k: (0, 0)),      # W1^T
            pl.BlockSpec((1, Hp), lambda i, k: (0, 0)),       # b1
        ],
        out_specs=pl.BlockSpec((tm, Hp), lambda i, k: (i, 0)),
        scratch_shapes=[pltpu.VMEM((tm, Fp), jnp.float32)],
        compiler_params=cparams,
    )(a1p, xp, w1t, b1p)

    # ---- Layer 2 + log_softmax --------------------------------------------
    out_padded = pl.pallas_call(
        functools.partial(sage_kernel, num_classes=c_real),
        out_shape=jax.ShapeDtypeStruct((Np, Cp), jnp.float32),
        grid=grid,
        in_specs=[
            pl.BlockSpec((tm, tk), lambda i, k: (i, k)),      # A2
            pl.BlockSpec((tk, Hp), lambda i, k: (k, 0)),      # H (neighbor rows)
            pl.BlockSpec((tm, Hp), lambda i, k: (i, 0)),      # H (root rows)
            pl.BlockSpec((2 * Hp, Cp), lambda i, k: (0, 0)),  # [Wl^T ; Wr^T]
            pl.BlockSpec((1, Cp), lambda i, k: (0, 0)),       # b2
        ],
        out_specs=pl.BlockSpec((tm, Cp), lambda i, k: (i, 0)),
        scratch_shapes=[pltpu.VMEM((tm, Hp), jnp.float32)],
        compiler_params=cparams,
    )(a2p, h, h, wcat, b2p)

    return out_padded[:n_real, :c_real]


# ---------------------------------------------------------------------------
# One-time preprocessing (hoisted out of the forward path)
# ---------------------------------------------------------------------------
def prepare_params(w1, b1, w_l, w_r, b2):
    """Transpose, pad to 128-lane shapes, fuse [Wl^T ; Wr^T], cast weights bf16."""
    H, F = w1.shape
    C = w_l.shape[0]
    Fp, Hp, Cp = _round_up(F, LANE), _round_up(H, LANE), _round_up(C, LANE)

    w1t = jnp.zeros((Fp, Hp), jnp.float32).at[:F, :H].set(
        jnp.asarray(w1, jnp.float32).T).astype(jnp.bfloat16)
    b1p = jnp.zeros((1, Hp), jnp.float32).at[0, :H].set(
        jnp.asarray(b1, jnp.float32))
    wcat = jnp.zeros((2 * Hp, Cp), jnp.float32)
    wcat = wcat.at[:H, :C].set(jnp.asarray(w_l, jnp.float32).T)          # neighbor
    wcat = wcat.at[Hp:Hp + H, :C].set(jnp.asarray(w_r, jnp.float32).T)   # root
    wcat = wcat.astype(jnp.bfloat16)
    b2p = jnp.zeros((1, Cp), jnp.float32).at[0, :C].set(
        jnp.asarray(b2, jnp.float32))
    return w1t, b1p, wcat, b2p


def prepare_graph_inputs(a1, a2, x):
    """Pad node dim to the row/reduction tile, pad feature lanes to 128, and
    cast dominant-byte operands (A1, A2, X) to bf16 (halved HBM/VMEM traffic)."""
    N, F = x.shape
    Np, _, _ = _node_tiles(N)
    Fp = _round_up(F, LANE)
    a1p = jnp.zeros((Np, Np), jnp.float32).at[:N, :N].set(a1).astype(jnp.bfloat16)
    a2p = jnp.zeros((Np, Np), jnp.float32).at[:N, :N].set(a2).astype(jnp.bfloat16)
    xp = jnp.zeros((Np, Fp), jnp.float32).at[:N, :F].set(x).astype(jnp.bfloat16)
    return a1p, a2p, xp


def build_agg_matrices(edge_index, num_nodes):
    """edge_index: [2, E] int32 (row 0 = source j, row 1 = target i).
    Note: duplicate edges collapse to weight 1 (no scatter-add)."""
    src, dst = edge_index[0], edge_index[1]
    A = jnp.zeros((num_nodes, num_nodes), jnp.float32).at[dst, src].set(1.0)

    # GCNConv: self-loops + symmetric normalization, then MEAN aggregation.
    A_loop = A + jnp.eye(num_nodes, dtype=jnp.float32)
    deg = A_loop.sum(axis=1)
    dinv_sqrt = jnp.where(deg > 0, 1.0 / jnp.sqrt(deg), 0.0)
    M = A_loop * dinv_sqrt[:, None] * dinv_sqrt[None, :]
    a1 = M / jnp.maximum(A_loop.sum(axis=1, keepdims=True), 1.0)

    # SAGEConv: plain mean over incoming neighbors (no self-loops).
    indeg = A.sum(axis=1, keepdims=True)
    a2 = A / jnp.maximum(indeg, 1.0)
    return a1, a2


if __name__ == "__main__":
    # Small synthetic graph + deterministic parameters.
    N, F, H, C = 32, 16, 16, 8

    # Ring (both directions) + skip-3 (both directions) edges -> E = 128.
    idx = jnp.arange(N, dtype=jnp.int32)
    src = jnp.concatenate([idx, (idx + 1) % N, idx, (idx + 3) % N])
    dst = jnp.concatenate([(idx + 1) % N, idx, (idx + 3) % N, idx])
    edge_index = jnp.stack([src, dst], axis=0)            # [2, 128]

    key = jax.random.PRNGKey(0)
    kx, k1, k2, k3 = jax.random.split(key, 4)
    x = jax.random.normal(kx, (N, F), jnp.float32)
    w1 = jax.random.normal(k1, (H, F), jnp.float32) * (1.0 / jnp.sqrt(F))
    b1 = jnp.zeros((H,), jnp.float32)
    w_l = jax.random.normal(k2, (C, H), jnp.float32) * (1.0 / jnp.sqrt(H))
    w_r = jax.random.normal(k3, (C, H), jnp.float32) * (1.0 / jnp.sqrt(H))
    b2 = jnp.zeros((C,), jnp.float32)

    a1, a2 = build_agg_matrices(edge_index, N)

    # One-time preprocessing (hoisted out of the forward path).
    a1p, a2p, xp = prepare_graph_inputs(a1, a2, x)
    w1t, b1p, wcat, b2p = prepare_params(w1, b1, w_l, w_r, b2)

    out = sage_forward(a1p, a2p, xp, w1t, b1p, wcat, b2p, N, C)
    out = jax.block_until_ready(out)
    assert out.shape == (N, C)

    # Tight reference: mirrors the kernel's bf16-input / f32-accumulate math.
    xw = jnp.dot(a1p, xp, preferred_element_type=jnp.float32)
    h_full = jnp.dot(xw.astype(jnp.bfloat16), w1t,
                     preferred_element_type=jnp.float32) + b1p
    hn = jnp.dot(a2p, h_full.astype(jnp.bfloat16),
                 preferred_element_type=jnp.float32)
    feats = jnp.concatenate([hn, h_full], axis=1).astype(jnp.bfloat16)
    z = jnp.dot(feats, wcat, preferred_element_type=jnp.float32) + b2p
    ref_tight = jax.nn.log_softmax(z[:N, :C], axis=1)
    assert jnp.allclose(out, ref_tight, atol=1e-3, rtol=1e-3)

    # Loose semantic reference: full f32 math of the original module.
    h32 = a1 @ (x @ w1.T) + b1[None, :]
    z32 = (a2 @ h32) @ w_l.T + h32 @ w_r.T + b2[None, :]
    ref32 = jax.nn.log_softmax(z32, axis=1)
    assert jnp.allclose(out, ref32, atol=1e-1, rtol=1e-1)

    print("KERNEL_OK")
</pallas_src>

<mosaic_0001>
module attributes {stable_mosaic.version = 11 : i64} {
  func.func @gcn_kernel(%arg0: i32, %arg1: i32, %arg2: memref<128x128xbf16, #tpu.memory_space<vmem>>, %arg3: memref<128x128xbf16, #tpu.memory_space<vmem>>, %arg4: memref<128x128xbf16, #tpu.memory_space<vmem>>, %arg5: memref<1x128xf32, #tpu.memory_space<vmem>>, %arg6: memref<128x128xf32, #tpu.memory_space<vmem>>, %arg7: memref<128x128xf32, #tpu.memory_space<vmem>>) attributes {dimension_semantics = [#tpu.dimension_semantics<parallel>, #tpu.dimension_semantics<arbitrary>], iteration_bounds = array<i64: 1, 1>, scalar_prefetch = 0 : i64, scratch_operands = 1 : i64, tpu.core_type = #tpu.core_type<tc>, window_params = [{transform_indices = @transform_0, window_bounds = array<i64: 128, 128>}, {transform_indices = @transform_1, window_bounds = array<i64: 128, 128>}, {pipeline_mode = #tpu.pipeline_mode<synchronous>, transform_indices = @transform_2, window_bounds = array<i64: 128, 128>}, {pipeline_mode = #tpu.pipeline_mode<synchronous>, transform_indices = @transform_3, window_bounds = array<i64: 1, 128>}, {transform_indices = @transform_4, window_bounds = array<i64: 128, 128>}]} {
    %c0_i32 = arith.constant 0 : i32
    %0 = arith.cmpi eq, %arg1, %c0_i32 : i32
    %1 = arith.extui %0 : i1 to i32
    %c0_i32_0 = arith.constant 0 : i32
    %2 = arith.cmpi ne, %1, %c0_i32_0 : i32
    scf.if %2 {
      %cst_10 = arith.constant 0.000000e+00 : f32
      %12 = vector.broadcast %cst_10 : f32 to vector<128x128xf32>
      %c0_11 = arith.constant 0 : index
      %c0_12 = arith.constant 0 : index
      %13 = vector.load %arg7[%c0_11, %c0_12] : memref<128x128xf32, #tpu.memory_space<vmem>>, vector<128x128xf32>
      tpu.vector_store %arg7[%c0_11, %c0_12], %12 {strides = array<i32>} : memref<128x128xf32, #tpu.memory_space<vmem>>, vector<128x128xf32>,
    } else {
    }
    %c0 = arith.constant 0 : index
    %c0_1 = arith.constant 0 : index
    %3 = vector.load %arg7[%c0, %c0_1] : memref<128x128xf32, #tpu.memory_space<vmem>>, vector<128x128xf32>
    %c0_2 = arith.constant 0 : index
    %c0_3 = arith.constant 0 : index
    %4 = vector.load %arg2[%c0_2, %c0_3] : memref<128x128xbf16, #tpu.memory_space<vmem>>, vector<128x128xbf16>
    %c0_4 = arith.constant 0 : index
    %c0_5 = arith.constant 0 : index
    %5 = vector.load %arg3[%c0_4, %c0_5] : memref<128x128xbf16, #tpu.memory_space<vmem>>, vector<128x128xbf16>
    %cst = arith.constant dense<0.000000e+00> : vector<128x128xf32>
    %6 = tpu.matmul %4, %5, %cst {dimension_numbers = #tpu.dot_dimension_numbers<[1], [0], [0], [1], [0, 0, 1, 1], [], []>} : vector<128x128xbf16>, vector<128x128xbf16>, vector<128x128xf32> -> vector<128x128xf32>
    %7 = arith.addf %3, %6 : vector<128x128xf32>
    %c0_6 = arith.constant 0 : index
    %c0_7 = arith.constant 0 : index
    %8 = vector.load %arg7[%c0_6, %c0_7] : memref<128x128xf32, #tpu.memory_space<vmem>>, vector<128x128xf32>
    tpu.vector_store %arg7[%c0_6, %c0_7], %7 {strides = array<i32>} : memref<128x128xf32, #tpu.memory_space<vmem>>, vector<128x128xf32>,
    %c0_i32_8 = arith.constant 0 : i32
    %9 = arith.cmpi eq, %arg1, %c0_i32_8 : i32
    %10 = arith.extui %9 : i1 to i32
    %c0_i32_9 = arith.constant 0 : i32
    %11 = arith.cmpi ne, %10, %c0_i32_9 : i32
    scf.if %11 {
      %c0_10 = arith.constant 0 : index
      %c0_11 = arith.constant 0 : index
      %12 = vector.load %arg7[%c0_10, %c0_11] : memref<128x128xf32, #tpu.memory_space<vmem>>, vector<128x128xf32>
      %13 = arith.truncf %12 : vector<128x128xf32> to vector<128x128xbf16>
      %c0_12 = arith.constant 0 : index
      %c0_13 = arith.constant 0 : index
      %14 = vector.load %arg4[%c0_12, %c0_13] : memref<128x128xbf16, #tpu.memory_space<vmem>>, vector<128x128xbf16>
      %cst_14 = arith.constant dense<0.000000e+00> : vector<128x128xf32>
      %15 = tpu.matmul %13, %14, %cst_14 {dimension_numbers = #tpu.dot_dimension_numbers<[1], [0], [0], [1], [0, 0, 1, 1], [], []>} : vector<128x128xbf16>, vector<128x128xbf16>, vector<128x128xf32> -> vector<128x128xf32>
      %c0_15 = arith.constant 0 : index
      %c0_16 = arith.constant 0 : index
      %16 = vector.load %arg5[%c0_15, %c0_16] : memref<1x128xf32, #tpu.memory_space<vmem>>, vector<1x128xf32>
      %17 = vector.broadcast %16 : vector<1x128xf32> to vector<128x128xf32>
      %18 = arith.addf %15, %17 : vector<128x128xf32>
      %c0_17 = arith.constant 0 : index
      %c0_18 = arith.constant 0 : index
      %19 = vector.load %arg6[%c0_17, %c0_18] : memref<128x128xf32, #tpu.memory_space<vmem>>, vector<128x128xf32>
      tpu.vector_store %arg6[%c0_17, %c0_18], %18 {strides = array<i32>} : memref<128x128xf32, #tpu.memory_space<vmem>>, vector<128x128xf32>,
    } else {
    }
    return
  }
  func.func @transform_0(%arg0: i32, %arg1: i32) -> (i32, i32) {
    %c0_i32 = arith.constant 0 : i32
    return %arg0, %arg1 : i32, i32
  }
  func.func @transform_1(%arg0: i32, %arg1: i32) -> (i32, i32) {
    %c0_i32 = arith.constant 0 : i32
    %c0_i32_0 = arith.constant 0 : i32
    return %arg1, %c0_i32 : i32, i32
  }
  func.func @transform_2(%arg0: i32, %arg1: i32) -> (i32, i32) {
    %c0_i32 = arith.constant 0 : i32
    %c0_i32_0 = arith.constant 0 : i32
    %c0_i32_1 = arith.constant 0 : i32
    return %c0_i32, %c0_i32_0 : i32, i32
  }
  func.func @transform_3(%arg0: i32, %arg1: i32) -> (i32, i32) {
    %c0_i32 = arith.constant 0 : i32
    %c0_i32_0 = arith.constant 0 : i32
    %c0_i32_1 = arith.constant 0 : i32
    return %c0_i32, %c0_i32_0 : i32, i32
  }
  func.func @transform_4(%arg0: i32, %arg1: i32) -> (i32, i32) {
    %c0_i32 = arith.constant 0 : i32
    %c0_i32_0 = arith.constant 0 : i32
    return %arg0, %c0_i32 : i32, i32
  }
}

module attributes {stable_mosaic.version = 11 : i64} {
  func.func @sage_kernel(%arg0: i32, %arg1: i32, %arg2: memref<128x128xbf16, #tpu.memory_space<vmem>>, %arg3: memref<128x128xf32, #tpu.memory_space<vmem>>, %arg4: memref<128x128xf32, #tpu.memory_space<vmem>>, %arg5: memref<256x128xbf16, #tpu.memory_space<vmem>>, %arg6: memref<1x128xf32, #tpu.memory_space<vmem>>, %arg7: memref<128x128xf32, #tpu.memory_space<vmem>>, %arg8: memref<128x128xf32, #tpu.memory_space<vmem>>) attributes {dimension_semantics = [#tpu.dimension_semantics<parallel>, #tpu.dimension_semantics<arbitrary>], iteration_bounds = array<i64: 1, 1>, scalar_prefetch = 0 : i64, scratch_operands = 1 : i64, tpu.core_type = #tpu.core_type<tc>, window_params = [{transform_indices = @transform_0, window_bounds = array<i64: 128, 128>}, {transform_indices = @transform_1, window_bounds = array<i64: 128, 128>}, {transform_indices = @transform_2, window_bounds = array<i64: 128, 128>}, {pipeline_mode = #tpu.pipeline_mode<synchronous>, transform_indices = @transform_3, window_bounds = array<i64: 256, 128>}, {pipeline_mode = #tpu.pipeline_mode<synchronous>, transform_indices = @transform_4, window_bounds = array<i64: 1, 128>}, {transform_indices = @transform_5, window_bounds = array<i64: 128, 128>}]} {
    %c0_i32 = arith.constant 0 : i32
    %0 = arith.cmpi eq, %arg1, %c0_i32 : i32
    %1 = arith.extui %0 : i1 to i32
    %c0_i32_0 = arith.constant 0 : i32
    %2 = arith.cmpi ne, %1, %c0_i32_0 : i32
    scf.if %2 {
      %cst_10 = arith.constant 0.000000e+00 : f32
      %13 = vector.broadcast %cst_10 : f32 to vector<128x128xf32>
      %c0_11 = arith.constant 0 : index
      %c0_12 = arith.constant 0 : index
      %14 = vector.load %arg8[%c0_11, %c0_12] : memref<128x128xf32, #tpu.memory_space<vmem>>, vector<128x128xf32>
      tpu.vector_store %arg8[%c0_11, %c0_12], %13 {strides = array<i32>} : memref<128x128xf32, #tpu.memory_space<vmem>>, vector<128x128xf32>,
    } else {
    }
    %c0 = arith.constant 0 : index
    %c0_1 = arith.constant 0 : index
    %3 = vector.load %arg8[%c0, %c0_1] : memref<128x128xf32, #tpu.memory_space<vmem>>, vector<128x128xf32>
    %c0_2 = arith.constant 0 : index
    %c0_3 = arith.constant 0 : index
    %4 = vector.load %arg2[%c0_2, %c0_3] : memref<128x128xbf16, #tpu.memory_space<vmem>>, vector<128x128xbf16>
    %c0_4 = arith.constant 0 : index
    %c0_5 = arith.constant 0 : index
    %5 = vector.load %arg3[%c0_4, %c0_5] : memref<128x128xf32, #tpu.memory_space<vmem>>, vector<128x128xf32>
    %6 = arith.truncf %5 : vector<128x128xf32> to vector<128x128xbf16>
    %cst = arith.constant dense<0.000000e+00> : vector<128x128xf32>
    %7 = tpu.matmul %4, %6, %cst {dimension_numbers = #tpu.dot_dimension_numbers<[1], [0], [0], [1], [0, 0, 1, 1], [], []>} : vector<128x128xbf16>, vector<128x128xbf16>, vector<128x128xf32> -> vector<128x128xf32>
    %8 = arith.addf %3, %7 : vector<128x128xf32>
    %c0_6 = arith.constant 0 : index
    %c0_7 = arith.constant 0 : index
    %9 = vector.load %arg8[%c0_6, %c0_7] : memref<128x128xf32, #tpu.memory_space<vmem>>, vector<128x128xf32>
    tpu.vector_store %arg8[%c0_6, %c0_7], %8 {strides = array<i32>} : memref<128x128xf32, #tpu.memory_space<vmem>>, vector<128x128xf32>,
    %c0_i32_8 = arith.constant 0 : i32
    %10 = arith.cmpi eq, %arg1, %c0_i32_8 : i32
    %11 = arith.extui %10 : i1 to i32
    %c0_i32_9 = arith.constant 0 : i32
    %12 = arith.cmpi ne, %11, %c0_i32_9 : i32
    scf.if %12 {
      %c0_10 = arith.constant 0 : index
      %c0_11 = arith.constant 0 : index
      %13 = vector.load %arg8[%c0_10, %c0_11] : memref<128x128xf32, #tpu.memory_space<vmem>>, vector<128x128xf32>
      %c0_12 = arith.constant 0 : index
      %c0_13 = arith.constant 0 : index
      %14 = vector.load %arg4[%c0_12, %c0_13] : memref<128x128xf32, #tpu.memory_space<vmem>>, vector<128x128xf32>
      %15 = tpu.concatenate %13, %14 in 1 : vector<128x128xf32>, vector<128x128xf32> -> vector<128x256xf32>
      %16 = arith.truncf %15 : vector<128x256xf32> to vector<128x256xbf16>
      %c0_14 = arith.constant 0 : index
      %c0_15 = arith.constant 0 : index
      %17 = vector.load %arg5[%c0_14, %c0_15] : memref<256x128xbf16, #tpu.memory_space<vmem>>, vector<256x128xbf16>
      %cst_16 = arith.constant dense<0.000000e+00> : vector<128x128xf32>
      %18 = tpu.matmul %16, %17, %cst_16 {dimension_numbers = #tpu.dot_dimension_numbers<[1], [0], [0], [1], [0, 0, 1, 1], [], []>} : vector<128x256xbf16>, vector<256x128xbf16>, vector<128x128xf32> -> vector<128x128xf32>
      %c0_17 = arith.constant 0 : index
      %c0_18 = arith.constant 0 : index
      %19 = vector.load %arg6[%c0_17, %c0_18] : memref<1x128xf32, #tpu.memory_space<vmem>>, vector<1x128xf32>
      %20 = vector.broadcast %19 : vector<1x128xf32> to vector<128x128xf32>
      %21 = arith.addf %18, %20 : vector<128x128xf32>
      %22 = tpu.iota {dimensions = array<i32: 1>} : vector<128x128xi32>
      %c8_i32 = arith.constant 8 : i32
      %23 = vector.broadcast %c8_i32 : i32 to vector<128x128xi32>
      %24 = arith.cmpi slt, %22, %23 : vector<128x128xi32>
      %cst_19 = arith.constant -1.000000e+30 : f32
      %25 = vector.broadcast %cst_19 : f32 to vector<128x128xf32>
      %26 = arith.select %24, %21, %25 : vector<128x128xi1>, vector<128x128xf32>
      %cst_20 = arith.constant dense<0xFF800000> : vector<128xf32>
      %27 = vector.multi_reduction <maximumf>, %26, %cst_20 [1] : vector<128x128xf32> to vector<128xf32>
      %28 = vector.shape_cast %27 : vector<128xf32> to vector<128x1xf32>
      %29 = vector.broadcast %28 : vector<128x1xf32> to vector<128x128xf32>
      %30 = arith.subf %26, %29 : vector<128x128xf32>
      %31 = math.exp %30 : vector<128x128xf32>
      %cst_21 = arith.constant 0.000000e+00 : f32
      %32 = vector.broadcast %cst_21 : f32 to vector<128x128xf32>
      %33 = arith.select %24, %31, %32 : vector<128x128xi1>, vector<128x128xf32>
      %cst_22 = arith.constant dense<0.000000e+00> : vector<128xf32>
      %34 = vector.multi_reduction <add>, %33, %cst_22 [1] : vector<128x128xf32> to vector<128xf32>
      %35 = vector.shape_cast %34 : vector<128xf32> to vector<128x1xf32>
      %36 = math.log %35 : vector<128x1xf32>
      %37 = arith.addf %36, %28 : vector<128x1xf32>
      %38 = vector.broadcast %37 : vector<128x1xf32> to vector<128x128xf32>
      %39 = arith.subf %21, %38 : vector<128x128xf32>
      %c0_23 = arith.constant 0 : index
      %c0_24 = arith.constant 0 : index
      %40 = vector.load %arg7[%c0_23, %c0_24] : memref<128x128xf32, #tpu.memory_space<vmem>>, vector<128x128xf32>
      tpu.vector_store %arg7[%c0_23, %c0_24], %39 {strides = array<i32>} : memref<128x128xf32, #tpu.memory_space<vmem>>, vector<128x128xf32>,
    } else {
    }
    return
  }
  func.func @transform_0(%arg0: i32, %arg1: i32) -> (i32, i32) {
    %c0_i32 = arith.constant 0 : i32
    return %arg0, %arg1 : i32, i32
  }
  func.func @transform_1(%arg0: i32, %arg1: i32) -> (i32, i32) {
    %c0_i32 = arith.constant 0 : i32
    %c0_i32_0 = arith.constant 0 : i32
    return %arg1, %c0_i32 : i32, i32
  }
  func.func @transform_2(%arg0: i32, %arg1: i32) -> (i32, i32) {
    %c0_i32 = arith.constant 0 : i32
    %c0_i32_0 = arith.constant 0 : i32
    return %arg0, %c0_i32 : i32, i32
  }
  func.func @transform_3(%arg0: i32, %arg1: i32) -> (i32, i32) {
    %c0_i32 = arith.constant 0 : i32
    %c0_i32_0 = arith.constant 0 : i32
    %c0_i32_1 = arith.constant 0 : i32
    return %c0_i32, %c0_i32_0 : i32, i32
  }
  func.func @transform_4(%arg0: i32, %arg1: i32) -> (i32, i32) {
    %c0_i32 = arith.constant 0 : i32
    %c0_i32_0 = arith.constant 0 : i32
    %c0_i32_1 = arith.constant 0 : i32
    return %c0_i32, %c0_i32_0 : i32, i32
  }
  func.func @transform_5(%arg0: i32, %arg1: i32) -> (i32, i32) {
    %c0_i32 = arith.constant 0 : i32
    %c0_i32_0 = arith.constant 0 : i32
    return %arg0, %c0_i32 : i32, i32
  }
}

</mosaic_0001>

<bundles_post_ra>
// kernel: sage_forward.2
= control target key start
LH: loop header
LB: loop body
LE: loop exit
PB: predicated region body
PF: predicated region fallthrough
CT: control target
= control target key end

     0   :  { %9 = vsyncpa [#allocation4], 0  ;;  %s977_s0 = inlined_call_operand.hbm [shape: bf16[128,128], index: 0, kind: input, shape index: {}]   ;;  %s978_s1 = inlined_call_operand.hbm [shape: bf16[128,128], index: 1, kind: input, shape index: {}]   ;;  %s979_s2 = inlined_call_operand.hbm [shape: bf16[128,128], index: 2, kind: input, shape index: {}]   ;;  %s980_s3 = inlined_call_operand.hbm [shape: f32[1,128], index: 3, kind: input, shape index: {}]   ;;  %s981_s4 = inlined_call_operand.hbm [shape: f32[128,128], index: 4, kind: output, shape index: {}]  }
   0x1   :  { %10 = vsyncpa [#allocation7], 0 }
   0x2   :  { %11 = vsyncpa [#allocation10], 0 }
   0x3   :  { %12 = vsyncpa [#allocation5], 0  ;;  %s867_s15 = smov [#allocation6]   ;;  %s868_s17 = smov [#allocation3]  }
   0x4   :  { %s30_s16 = sshll.u32 %s867_s15, 4  ;;  %s18_s18 = sshll.u32 %s868_s17, 4  ;;  %s31_s16 = int_to_ptr.vmem [resolvable:$true] %s30_s16  ;;  %s901_s18 = int_to_ptr.vmem [resolvable:$true] %s18_s18 }
   0x5   :  { %s749_s21 = scalar_lea.hbm %s978_s1, 1024 }
   0x6   :  { %p750_p0 = scmp.ne.s32.totalorder %s978_s1, %s749_s21  ;;  %p753_p1 = scmp.lt.u32.totalorder %s749_s21, %s978_s1 }
   0x8   :  { %p755_p2 = pnand %p753_p1, %p750_p0 }
   0xa   :  { %758 = shalt.err (!%p755_p2)
}
   0xb   :  { %s759_s26 = scalar_lea.vmem %s31_s16, 1024  ;;  %p764_p4 = scmp.lt.s32.totalorder %s31_s16, %s31_s16 }
   0xc   :  { %p760_p3 = scmp.ne.s32.totalorder %s31_s16, %s759_s26  ;;  %p765_p5 = scmp.lt.s32.totalorder %s759_s26, %s759_s26 }
   0xe   :  { %p766_p6 = por %p765_p5, %p764_p4 }
  0x10   :  { %p767_p7 = pnand %p766_p6, %p760_p3 }
  0x12   :  { %770 = shalt.err (!%p767_p7)
}
  0x13   :  { %s869_s27 = smov 64   ;;  %s870_s28 = smov 4  }
  0x14   :  { %36 = dma.hbm_to_vmem [thread:$0]  %s978_s1, 1024, %s31_s16, [#allocation7], %s869_s27, %s869_s27, %s870_s28  }
  0x15   :  { %s771_s7 = scalar_lea.hbm %s977_s0, 1024 }
  0x16   :  { %p772_p8 = scmp.ne.s32.totalorder %s977_s0, %s771_s7  ;;  %p775_p9 = scmp.lt.u32.totalorder %s771_s7, %s977_s0 }
  0x18   :  { %p777_p10 = pnand %p775_p9, %p772_p8 }
  0x1a   :  { %780 = shalt.err (!%p777_p10)
}
  0x1b   :  { %s781_s12 = scalar_lea.vmem %s901_s18, 1024  ;;  %p786_p12 = scmp.lt.s32.totalorder %s901_s18, %s901_s18 }
  0x1c   :  { %p782_p11 = scmp.ne.s32.totalorder %s901_s18, %s781_s12  ;;  %p787_p13 = scmp.lt.s32.totalorder %s781_s12, %s781_s12 }
  0x1e   :  { %p788_p0 = por %p787_p13, %p786_p12 }
  0x20   :  { %p789_p1 = pnand %p788_p0, %p782_p11 }
  0x22   :  { %792 = shalt.err (!%p789_p1)
}
  0x23   :  { %24 = dma.hbm_to_vmem [thread:$0]  %s977_s0, 1024, %s901_s18, [#allocation4], %s869_s27, %s869_s27, %s870_s28  }
  0x24   :  { %s871_s14 = smov [#allocation8]   ;;  %s872_s16 = smov [#allocation9]  }
  0x25   :  { %s42_s15 = sshll.u32 %s871_s14, 4  ;;  %s55_s17 = sshll.u32 %s872_s16, 4  ;;  %s43_s15 = int_to_ptr.vmem [resolvable:$true] %s42_s15  ;;  %s56_s17 = int_to_ptr.vmem [resolvable:$true] %s55_s17 }
  0x26   :  { %s793_s21 = scalar_lea.hbm %s979_s2, 1024 }
  0x27   :  { %p794_p2 = scmp.ne.s32.totalorder %s979_s2, %s793_s21  ;;  %p797_p3 = scmp.lt.u32.totalorder %s793_s21, %s979_s2 }
  0x29   :  { %p799_p4 = pnand %p797_p3, %p794_p2 }
  0x2b   :  { %802 = shalt.err (!%p799_p4)
}
  0x2c   :  { %s803_s0 = scalar_lea.vmem %s43_s15, 1024  ;;  %p808_p6 = scmp.lt.s32.totalorder %s43_s15, %s43_s15 }
  0x2d   :  { %p804_p5 = scmp.ne.s32.totalorder %s43_s15, %s803_s0  ;;  %p809_p7 = scmp.lt.s32.totalorder %s803_s0, %s803_s0 }
  0x2f   :  { %p810_p8 = por %p809_p7, %p808_p6 }
  0x31   :  { %p811_p9 = pnand %p810_p8, %p804_p5 }
  0x33   :  { %814 = shalt.err (!%p811_p9)
}
  0x34   :  { %48 = dma.hbm_to_vmem [thread:$0]  %s979_s2, 1024, %s43_s15, [#allocation7], %s869_s27, %s869_s27, %s870_s28  }
  0x35   :  { %s815_s5 = scalar_lea.hbm %s980_s3, 16 }
  0x36   :  { %p816_p10 = scmp.ne.s32.totalorder %s980_s3, %s815_s5  ;;  %p819_p11 = scmp.lt.u32.totalorder %s815_s5, %s980_s3 }
  0x38   :  { %p821_p12 = pnand %p819_p11, %p816_p10 }
  0x3a   :  { %824 = shalt.err (!%p821_p12)
}
  0x3b   :  { %s825_s10 = scalar_lea.vmem %s56_s17, 16  ;;  %s829_s11 = scalar_lea.vmem %s56_s17, 32 }
  0x3c   :  { %p826_p13 = scmp.ne.s32.totalorder %s56_s17, %s825_s10  ;;  %p830_p0 = scmp.lt.s32.totalorder %s56_s17, %s56_s17 }
  0x3d   :  { %p831_p1 = scmp.lt.s32.totalorder %s829_s11, %s825_s10 }
  0x3f   :  { %p832_p2 = por %p831_p1, %p830_p0 }
  0x41   :  { %p833_p3 = pnand %p832_p2, %p826_p13 }
  0x43   :  { %836 = shalt.err (!%p833_p3)
}
  0x44   :  { %58 = dma.hbm_to_vmem [thread:$0]  %s980_s3, 16, %s56_s17, [#allocation10]  }
  0x45   :  { %859 = dma.done.wait [#allocation4], 1024  }
  0x46   :  { %860 = vsyncadd [#allocation4], 4294966272 }
  0x47   :  { %861 = dma.done.wait [#allocation7], 2048  }
  0x48   :  { %862 = vsyncadd [#allocation7], 4294965248 }
  0x49   :  { %863 = dma.done.wait [#allocation10], 16  }
  0x4a   :  { %864 = vsyncadd [#allocation10], 4294967280  ;;  %v725_v0 = vld [vmem:[#allocation6] sm:$0xff]   ;;  %v726_v1 = vld [vmem:[#allocation6 + $0x8] sm:$0xff]   ;;  %s873_s3 = smov [#allocation11]  }
  0x4b   :  { %652 = vmatprep.subr.bf16.mxu0 %v725_v0  ;;  %v727_v2 = vld [vmem:[#allocation6 + $0x10] sm:$0xff]   ;;  %v728_v3 = vld [vmem:[#allocation6 + $0x18] sm:$0xff]   ;;  %v733_v4 = vld [vmem:[#allocation3] sm:$0xff]   ;;  %s581_s28 = sshll.u32 %s873_s3, 4  ;;  %s582_s28 = int_to_ptr.vmem [resolvable:$true] %s581_s28 }
  0x4c   :  { %653 = vmatpush3.bf16.msra.mxu0 %v725_v0  ;;  %668 = vmatprep.mubr.bf16.mxu0 %v733_v4  ;;  %v729_v5 = vld [vmem:[#allocation6 + $0x20] sm:$0xff]   ;;  %v730_v6 = vld [vmem:[#allocation6 + $0x28] sm:$0xff]   ;;  %v731_v9 = vld [vmem:[#allocation6 + $0x30] sm:$0xff]   ;;  %s837_s12 = scalar_lea.vmem %s582_s28, 2048  ;;  %p842_p5 = scmp.lt.s32.totalorder %s582_s28, %s582_s28 }
  0x4d   :  { %654 = vmatprep.subr.bf16.mxu0 %v726_v1  ;;  %v741_v7 = vld [vmem:[#allocation8] sm:$0xff]   ;;  %v742_v8 = vld [vmem:[#allocation8 + $0x8] sm:$0xff]   ;;  %v743_v10 = vld [vmem:[#allocation8 + $0x10] sm:$0xff]   ;;  %p838_p4 = scmp.ne.s32.totalorder %s582_s28, %s837_s12  ;;  %p843_p6 = scmp.lt.s32.totalorder %s837_s12, %s837_s12 }
  0x4e   :  { %684 = vmatprep.subr.bf16.mxu1 %v741_v7  ;;  %v732_v11 = vld [vmem:[#allocation6 + $0x38] sm:$0xff]   ;;  %v745_v13 = vld [vmem:[#allocation8 + $0x20] sm:$0xff]   ;;  %v734_v14 = vld [vmem:[#allocation3 + $0x8] sm:$0xff]  }
  0x4f   :  { %685 = vmatpush3.bf16.msra.mxu1 %v741_v7  ;;  %v744_v12 = vld [vmem:[#allocation8 + $0x18] sm:$0xff]   ;;  %v735_v15 = vld [vmem:[#allocation3 + $0x10] sm:$0xff]   ;;  %v746_v16 = vld [vmem:[#allocation8 + $0x28] sm:$0xff]   ;;  %p844_p7 = por %p843_p6, %p842_p5 }
  0x50   :  { %655 = vmatpush3.bf16.msra.mxu0 %v726_v1  ;;  %686 = vmatprep.subr.bf16.mxu1 %v742_v8  ;;  %v747_v17 = vld [vmem:[#allocation8 + $0x30] sm:$0xff]   ;;  %v736_v18 = vld [vmem:[#allocation3 + $0x18] sm:$0xff]   ;;  %v737_v19 = vld [vmem:[#allocation3 + $0x20] sm:$0xff]  }
  0x51   :  { %656 = vmatprep.subr.bf16.mxu0 %v727_v2  ;;  %v738_v20 = vld [vmem:[#allocation3 + $0x28] sm:$0xff]   ;;  %v739_v21 = vld [vmem:[#allocation3 + $0x30] sm:$0xff]   ;;  %v740_v22 = vld [vmem:[#allocation3 + $0x38] sm:$0xff]   ;;  %p845_p8 = pnand %p844_p7, %p838_p4 }
  0x52   :  { %v748_v23 = vld [vmem:[#allocation8 + $0x38] sm:$0xff]   ;;  %v611_v48 = vld [vmem:[#allocation9] ss:$0 sm:$0xff] }
  0x53   :  { %687 = vmatpush3.bf16.msra.mxu1 %v742_v8 }
  0x54   :  { %657 = vmatpush3.bf16.msra.mxu0 %v727_v2  ;;  %688 = vmatprep.subr.bf16.mxu1 %v743_v10 }
  0x55   :  { %658 = vmatprep.subr.bf16.mxu0 %v728_v3 }
  0x57   :  { %689 = vmatpush3.bf16.msra.mxu1 %v743_v10 }
  0x58   :  { %659 = vmatpush3.bf16.msra.mxu0 %v728_v3  ;;  %690 = vmatprep.subr.bf16.mxu1 %v744_v12 }
  0x59   :  { %660 = vmatprep.subr.bf16.mxu0 %v729_v5 }
  0x5b   :  { %691 = vmatpush3.bf16.msra.mxu1 %v744_v12 }
  0x5c   :  { %661 = vmatpush3.bf16.msra.mxu0 %v729_v5  ;;  %692 = vmatprep.subr.bf16.mxu1 %v745_v13 }
  0x5d   :  { %662 = vmatprep.subr.bf16.mxu0 %v730_v6 }
  0x5f   :  { %693 = vmatpush3.bf16.msra.mxu1 %v745_v13 }
  0x60   :  { %663 = vmatpush3.bf16.msra.mxu0 %v730_v6  ;;  %694 = vmatprep.subr.bf16.mxu1 %v746_v16 }
  0x61   :  { %664 = vmatprep.subr.bf16.mxu0 %v731_v9 }
  0x63   :  { %695 = vmatpush3.bf16.msra.mxu1 %v746_v16 }
  0x64   :  { %665 = vmatpush3.bf16.msra.mxu0 %v731_v9  ;;  %696 = vmatprep.subr.bf16.mxu1 %v747_v17 }
  0x65   :  { %666 = vmatprep.subr.bf16.mxu0 %v732_v11 }
  0x67   :  { %697 = vmatpush3.bf16.msra.mxu1 %v747_v17 }
  0x68   :  { %667 = vmatpush3.bf16.msra.mxu0 %v732_v11  ;;  %698 = vmatprep.subr.bf16.mxu1 %v748_v23 }
  0x6b   :  { %669 = vmatmul.mubr.bf16.vlgmr.msra.gmra.mrb[0].mxu0 %v734_v14  ;;  %699 = vmatpush3.bf16.msra.mxu1 %v748_v23 }
  0x6c   :  { %672 = vmatprep.mubr.bf16.mxu0 %v735_v15 }
  0x73   :  { %673 = vmatmul.mubr.bf16.gmra.mrb[4].mxu0 %v736_v18 }
  0x74   :  { %676 = vmatprep.mubr.bf16.mxu0 %v737_v19 }
  0x7b   :  { %677 = vmatmul.mubr.bf16.gmra.mrb[8].mxu0 %v738_v20 }
  0x7c   :  { %680 = vmatprep.mubr.bf16.mxu0 %v739_v21 }
  0x83   :  { %681 = vmatmul.mubr.bf16.gmra.mrb[12].mxu0 %v740_v22 }
 0x13e   :  { %v670_v24 = vpop.f32.mrb[0].mxu0 }
 0x13f   :  { %v270_v25 = vpop.f32.mrb[1].mxu0 }
 0x140   :  { %v671_v26 = vpop.f32.mrb[2].mxu0 }
 0x141   :  { %v385_v27 = vpack.c.bf16 %v671_v26, %v670_v24  ;;  %v273_v28 = vpop.f32.mrb[3].mxu0 }
 0x142   :  { %v384_v29 = vpack.c.bf16 %v273_v28, %v270_v25 }
 0x144   :  { %700 = vmatprep.mubr.bf16.mxu1 %v384_v29 }
 0x145   :  { %701 = vmatmul.mubr.bf16.vlgmr.msra.gmra.mrb[0].mxu1 %v385_v27 }
 0x146   :  { %v674_v30 = vpop.f32.mrb[4].mxu0 }
 0x147   :  { %v286_v31 = vpop.f32.mrb[5].mxu0 }
 0x148   :  { %v675_v32 = vpop.f32.mrb[6].mxu0 }
 0x149   :  { %v387_v33 = vpack.c.bf16 %v675_v32, %v674_v30  ;;  %v289_v34 = vpop.f32.mrb[7].mxu0 }
 0x14a   :  { %v386_v35 = vpack.c.bf16 %v289_v34, %v286_v31 }
 0x14c   :  { %704 = vmatprep.mubr.bf16.mxu1 %v386_v35 }
 0x14d   :  { %705 = vmatmul.mubr.bf16.gmra.mrb[4].mxu1 %v387_v33 }
 0x14e   :  { %v678_v36 = vpop.f32.mrb[8].mxu0 }
 0x14f   :  { %v302_v37 = vpop.f32.mrb[9].mxu0 }
 0x150   :  { %v679_v38 = vpop.f32.mrb[10].mxu0 }
 0x151   :  { %v389_v39 = vpack.c.bf16 %v679_v38, %v678_v36  ;;  %v305_v40 = vpop.f32.mrb[11].mxu0 }
 0x152   :  { %v388_v41 = vpack.c.bf16 %v305_v40, %v302_v37 }
 0x154   :  { %708 = vmatprep.mubr.bf16.mxu1 %v388_v41 }
 0x155   :  { %709 = vmatmul.mubr.bf16.gmra.mrb[8].mxu1 %v389_v39 }
 0x156   :  { %v682_v42 = vpop.f32.mrb[12].mxu0 }
 0x157   :  { %v318_v43 = vpop.f32.mrb[13].mxu0 }
 0x158   :  { %v683_v44 = vpop.f32.mrb[14].mxu0 }
 0x159   :  { %v391_v45 = vpack.c.bf16 %v683_v44, %v682_v42  ;;  %v321_v46 = vpop.f32.mrb[15].mxu0 }
 0x15a   :  { %v390_v47 = vpack.c.bf16 %v321_v46, %v318_v43 }
 0x15c   :  { %712 = vmatprep.mubr.bf16.mxu1 %v390_v47 }
 0x15d   :  { %713 = vmatmul.mubr.bf16.gmra.mrb[12].mxu1 %v391_v45 }
 0x218   :  { %v702_v49 = vpop.f32.mrb[0].mxu1 }
 0x219   :  { %v506_v50 = vadd.f32 %v702_v49, %v611_v48  ;;  %v497_v51 = vpop.f32.mrb[1].mxu1 }
 0x21a   :  { %v498_v52 = vadd.f32 %v611_v48, %v497_v51  ;;  %v703_v53 = vpop.f32.mrb[2].mxu1 }
 0x21b   :  { %562 = vst [vmem:[#allocation11 + $0x10] sm:$0xff] %v506_v50  ;;  %v509_v54 = vadd.f32 %v703_v53, %v611_v48  ;;  %v500_v55 = vpop.f32.mrb[3].mxu1 }
 0x21c   :  { %560 = vst [vmem:[#allocation11] sm:$0xff] %v498_v52  ;;  %v501_v56 = vadd.f32 %v611_v48, %v500_v55 }
 0x21d   :  { %563 = vst [vmem:[#allocation11 + $0x18] sm:$0xff] %v509_v54 }
 0x21e   :  { %561 = vst [vmem:[#allocation11 + $0x8] sm:$0xff] %v501_v56 }
 0x220   :  { %v706_v57 = vpop.f32.mrb[4].mxu1 }
 0x221   :  { %v522_v58 = vadd.f32 %v706_v57, %v611_v48  ;;  %v513_v59 = vpop.f32.mrb[5].mxu1 }
 0x222   :  { %v514_v60 = vadd.f32 %v611_v48, %v513_v59  ;;  %v707_v61 = vpop.f32.mrb[6].mxu1 }
 0x223   :  { %566 = vst [vmem:[#allocation11 + $0x30] sm:$0xff] %v522_v58  ;;  %v525_v62 = vadd.f32 %v707_v61, %v611_v48  ;;  %v516_v63 = vpop.f32.mrb[7].mxu1 }
 0x224   :  { %564 = vst [vmem:[#allocation11 + $0x20] sm:$0xff] %v514_v60  ;;  %v517_v0 = vadd.f32 %v611_v48, %v516_v63 }
 0x225   :  { %567 = vst [vmem:[#allocation11 + $0x38] sm:$0xff] %v525_v62 }
 0x226   :  { %565 = vst [vmem:[#allocation11 + $0x28] sm:$0xff] %v517_v0 }
 0x228   :  { %v710_v1 = vpop.f32.mrb[8].mxu1 }
 0x229   :  { %v538_v2 = vadd.f32 %v710_v1, %v611_v48  ;;  %v529_v3 = vpop.f32.mrb[9].mxu1 }
 0x22a   :  { %v530_v4 = vadd.f32 %v611_v48, %v529_v3  ;;  %v711_v5 = vpop.f32.mrb[10].mxu1 }
 0x22b   :  { %570 = vst [vmem:[#allocation11 + $0x50] sm:$0xff] %v538_v2  ;;  %v541_v6 = vadd.f32 %v711_v5, %v611_v48  ;;  %v532_v7 = vpop.f32.mrb[11].mxu1 }
 0x22c   :  { %568 = vst [vmem:[#allocation11 + $0x40] sm:$0xff] %v530_v4  ;;  %v533_v8 = vadd.f32 %v611_v48, %v532_v7 }
 0x22d   :  { %571 = vst [vmem:[#allocation11 + $0x58] sm:$0xff] %v541_v6 }
 0x22e   :  { %569 = vst [vmem:[#allocation11 + $0x48] sm:$0xff] %v533_v8 }
 0x230   :  { %v714_v9 = vpop.f32.mrb[12].mxu1 }
 0x231   :  { %v554_v10 = vadd.f32 %v714_v9, %v611_v48  ;;  %v545_v11 = vpop.f32.mrb[13].mxu1 }
 0x232   :  { %v546_v12 = vadd.f32 %v611_v48, %v545_v11  ;;  %v715_v13 = vpop.f32.mrb[14].mxu1 }
 0x233   :  { %574 = vst [vmem:[#allocation11 + $0x70] sm:$0xff] %v554_v10  ;;  %v557_v14 = vadd.f32 %v715_v13, %v611_v48  ;;  %v548_v15 = vpop.f32.mrb[15].mxu1 }
 0x234   :  { %572 = vst [vmem:[#allocation11 + $0x60] sm:$0xff] %v546_v12  ;;  %v549_v16 = vadd.f32 %v611_v48, %v548_v15 }
 0x235   :  { %575 = vst [vmem:[#allocation11 + $0x78] sm:$0xff] %v557_v14 }
 0x236   :  { %573 = vst [vmem:[#allocation11 + $0x68] sm:$0xff] %v549_v16 }
 0x237   :  { %848 = shalt.err (!%p845_p8)
}
 0x238   :  { %s849_s14 = scalar_lea.hbm %s981_s4, 2048 }
 0x239   :  { %p850_p9 = scmp.ne.s32.totalorder %s981_s4, %s849_s14  ;;  %p853_p10 = scmp.lt.u32.totalorder %s849_s14, %s981_s4 }
 0x23b   :  { %p855_p11 = pnand %p853_p10, %p850_p9 }
 0x23d   :  { %858 = shalt.err (!%p855_p11)
}
 0x23e   :  { %s874_s20 = smov 128   ;;  %s875_s21 = smov 8  }
 0x23f   :  { %587 = dma.vmem_to_hbm [thread:$0]  %s582_s28, 2048, %s981_s4, [#allocation5], %s874_s20, %s874_s20, %s875_s21  }
 0x240   :  { %865 = dma.done.wait [#allocation5], 2048  }
 0x241   :  { %866 = vsyncadd [#allocation5], 4294965248 }
 0x242   :  { %591 = vsyncpa [#allocation4], 1 }
 0x243   :  { %592 = vsyncpa [#allocation7], 1 }
 0x244   :  { %593 = vsyncpa [#allocation10], 1 }
 0x245   :  { %594 = vsyncpa [#allocation5], 1 }

// kernel: sage_forward.3
= control target key start
LH: loop header
LB: loop body
LE: loop exit
PB: predicated region body
PF: predicated region fallthrough
CT: control target
= control target key end

     0   :  { %10 = vsyncpa [#allocation4], 0  ;;  %s1659_s0 = inlined_call_operand.hbm [shape: bf16[128,128], index: 0, kind: input, shape index: {}]   ;;  %s1660_s1 = inlined_call_operand.hbm [shape: f32[128,128], index: 1, kind: input, shape index: {}, may-alias: {1,2}]   ;;  %s1661_s2 = inlined_call_operand.hbm [shape: f32[128,128], index: 2, kind: input, shape index: {}, may-alias: {1,2}]   ;;  %s1662_s3 = inlined_call_operand.hbm [shape: bf16[256,128], index: 3, kind: input, shape index: {}]   ;;  %s1663_s4 = inlined_call_operand.hbm [shape: f32[1,128], index: 4, kind: input, shape index: {}]   ;;  %s1664_s5 = inlined_call_operand.hbm [shape: f32[128,128], index: 5, kind: output, shape index: {}]  }
   0x1   :  { %11 = vsyncpa [#allocation7], 0 }
   0x2   :  { %12 = vsyncpa [#allocation10], 0 }
   0x3   :  { %13 = vsyncpa [#allocation5], 0  ;;  %s1261_s18 = smov [#allocation6]   ;;  %s1121_s22 = scalar_lea.hbm %s1660_s1, 2048 }
   0x4   :  { %s31_s19 = sshll.u32 %s1261_s18, 4  ;;  %p1122_p0 = scmp.ne.s32.totalorder %s1660_s1, %s1121_s22  ;;  %s32_s19 = int_to_ptr.vmem [resolvable:$true] %s31_s19 }
   0x5   :  { %p1125_p1 = scmp.lt.u32.totalorder %s1121_s22, %s1660_s1 }
   0x7   :  { %p1127_p2 = pnand %p1125_p1, %p1122_p0 }
   0x9   :  { %1130 = shalt.err (!%p1127_p2)
}
   0xa   :  { %s1131_s27 = scalar_lea.vmem %s32_s19, 2048  ;;  %p1136_p4 = scmp.lt.s32.totalorder %s32_s19, %s32_s19 }
   0xb   :  { %p1132_p3 = scmp.ne.s32.totalorder %s32_s19, %s1131_s27  ;;  %p1137_p5 = scmp.lt.s32.totalorder %s1131_s27, %s1131_s27 }
   0xd   :  { %p1138_p6 = por %p1137_p5, %p1136_p4 }
   0xf   :  { %p1139_p7 = pnand %p1138_p6, %p1132_p3 }
  0x11   :  { %1142 = shalt.err (!%p1139_p7)
}
  0x12   :  { %s1262_s28 = smov 128   ;;  %s1263_s29 = smov 8  }
  0x13   :  { %37 = dma.hbm_to_vmem [thread:$0]  %s1660_s1, 2048, %s32_s19, [#allocation7], %s1262_s28, %s1262_s28, %s1263_s29  }
  0x14   :  { %s1264_s7 = smov [#allocation9]   ;;  %s1265_s9 = smov [#allocation3]  }
  0x15   :  { %s55_s8 = sshll.u32 %s1264_s7, 4  ;;  %s19_s10 = sshll.u32 %s1265_s9, 4  ;;  %s56_s8 = int_to_ptr.vmem [resolvable:$true] %s55_s8  ;;  %s20_s10 = int_to_ptr.vmem [resolvable:$true] %s19_s10 }
  0x16   :  { %s1143_s13 = scalar_lea.hbm %s1662_s3, 2048 }
  0x17   :  { %p1144_p8 = scmp.ne.s32.totalorder %s1662_s3, %s1143_s13  ;;  %p1147_p9 = scmp.lt.u32.totalorder %s1143_s13, %s1662_s3 }
  0x19   :  { %p1149_p10 = pnand %p1147_p9, %p1144_p8 }
  0x1b   :  { %1152 = shalt.err (!%p1149_p10)
}
  0x1c   :  { %s1153_s1 = scalar_lea.vmem %s56_s8, 2048  ;;  %p1158_p12 = scmp.lt.s32.totalorder %s56_s8, %s56_s8 }
  0x1d   :  { %p1154_p11 = scmp.ne.s32.totalorder %s56_s8, %s1153_s1  ;;  %p1159_p13 = scmp.lt.s32.totalorder %s1153_s1, %s1153_s1 }
  0x1f   :  { %p1160_p0 = por %p1159_p13, %p1158_p12 }
  0x21   :  { %p1161_p1 = pnand %p1160_p0, %p1154_p11 }
  0x23   :  { %1164 = shalt.err (!%p1161_p1)
}
  0x24   :  { %s1266_s18 = smov 64   ;;  %s1267_s19 = smov 4  }
  0x25   :  { %61 = dma.hbm_to_vmem [thread:$0]  %s1662_s3, 2048, %s56_s8, [#allocation10], %s1266_s18, %s1266_s18, %s1267_s19  }
  0x26   :  { %s1165_s24 = scalar_lea.hbm %s1659_s0, 1024 }
  0x27   :  { %p1166_p2 = scmp.ne.s32.totalorder %s1659_s0, %s1165_s24  ;;  %p1169_p3 = scmp.lt.u32.totalorder %s1165_s24, %s1659_s0 }
  0x29   :  { %p1171_p4 = pnand %p1169_p3, %p1166_p2 }
  0x2b   :  { %1174 = shalt.err (!%p1171_p4)
}
  0x2c   :  { %s1175_s6 = scalar_lea.vmem %s20_s10, 1024  ;;  %p1180_p6 = scmp.lt.s32.totalorder %s20_s10, %s20_s10 }
  0x2d   :  { %p1176_p5 = scmp.ne.s32.totalorder %s20_s10, %s1175_s6  ;;  %p1181_p7 = scmp.lt.s32.totalorder %s1175_s6, %s1175_s6 }
  0x2f   :  { %p1182_p8 = por %p1181_p7, %p1180_p6 }
  0x31   :  { %p1183_p9 = pnand %p1182_p8, %p1176_p5 }
  0x33   :  { %1186 = shalt.err (!%p1183_p9)
}
  0x34   :  { %25 = dma.hbm_to_vmem [thread:$0]  %s1659_s0, 1024, %s20_s10, [#allocation4], %s1266_s18, %s1266_s18, %s1267_s19  }
  0x35   :  { %s1268_s8 = smov [#allocation8]   ;;  %s1269_s11 = smov [#allocation11]  }
  0x36   :  { %s43_s9 = sshll.u32 %s1268_s8, 4  ;;  %s68_s12 = sshll.u32 %s1269_s11, 4  ;;  %s44_s9 = int_to_ptr.vmem [resolvable:$true] %s43_s9  ;;  %s69_s12 = int_to_ptr.vmem [resolvable:$true] %s68_s12 }
  0x37   :  { %s1187_s15 = scalar_lea.hbm %s1661_s2, 2048 }
  0x38   :  { %p1188_p10 = scmp.ne.s32.totalorder %s1661_s2, %s1187_s15  ;;  %p1191_p11 = scmp.lt.u32.totalorder %s1187_s15, %s1661_s2 }
  0x3a   :  { %p1193_p12 = pnand %p1191_p11, %p1188_p10 }
  0x3c   :  { %1196 = shalt.err (!%p1193_p12)
}
  0x3d   :  { %s1197_s0 = scalar_lea.vmem %s44_s9, 2048  ;;  %p1202_p0 = scmp.lt.s32.totalorder %s44_s9, %s44_s9 }
  0x3e   :  { %p1198_p13 = scmp.ne.s32.totalorder %s44_s9, %s1197_s0  ;;  %p1203_p1 = scmp.lt.s32.totalorder %s1197_s0, %s1197_s0 }
  0x40   :  { %p1204_p2 = por %p1203_p1, %p1202_p0 }
  0x42   :  { %p1205_p3 = pnand %p1204_p2, %p1198_p13 }
  0x44   :  { %1208 = shalt.err (!%p1205_p3)
}
  0x45   :  { %49 = dma.hbm_to_vmem [thread:$0]  %s1661_s2, 2048, %s44_s9, [#allocation7], %s1262_s28, %s1262_s28, %s1263_s29  }
  0x46   :  { %s1209_s22 = scalar_lea.hbm %s1663_s4, 16 }
  0x47   :  { %p1210_p4 = scmp.ne.s32.totalorder %s1663_s4, %s1209_s22  ;;  %p1213_p5 = scmp.lt.u32.totalorder %s1209_s22, %s1663_s4 }
  0x49   :  { %p1215_p6 = pnand %p1213_p5, %p1210_p4 }
  0x4b   :  { %1218 = shalt.err (!%p1215_p6)
}
  0x4c   :  { %s1219_s27 = scalar_lea.vmem %s69_s12, 16  ;;  %s1223_s30 = scalar_lea.vmem %s69_s12, 32 }
  0x4d   :  { %p1220_p7 = scmp.ne.s32.totalorder %s69_s12, %s1219_s27  ;;  %p1224_p8 = scmp.lt.s32.totalorder %s69_s12, %s69_s12 }
  0x4e   :  { %p1225_p9 = scmp.lt.s32.totalorder %s1223_s30, %s1219_s27 }
  0x50   :  { %p1226_p10 = por %p1225_p9, %p1224_p8 }
  0x52   :  { %p1227_p11 = pnand %p1226_p10, %p1220_p7 }
  0x54   :  { %1230 = shalt.err (!%p1227_p11)
}
  0x55   :  { %71 = dma.hbm_to_vmem [thread:$0]  %s1663_s4, 16, %s69_s12, [#allocation10]  }
  0x56   :  { %1253 = dma.done.wait [#allocation4], 1024  }
  0x57   :  { %1254 = vsyncadd [#allocation4], 4294966272 }
  0x58   :  { %1255 = dma.done.wait [#allocation7], 4096  }
  0x59   :  { %1256 = vsyncadd [#allocation7], 4294963200 }
  0x5a   :  { %1257 = dma.done.wait [#allocation10], 2064  }
  0x5b   :  { %1258 = vsyncadd [#allocation10], 4294965232  ;;  %v140_v0 = vld [vmem:[#allocation6] sm:$0xff]  ;;  %v141_v1 = vld [vmem:[#allocation6 + $0x8] sm:$0xff]  ;;  %s1270_s4 = smov [#allocation12]  }
  0x5c   :  { %v142_v2 = vld [vmem:[#allocation6 + $0x10] sm:$0xff]  ;;  %v156_v3 = vpack.c.bf16 %v141_v1, %v140_v0  ;;  %v143_v4 = vld [vmem:[#allocation6 + $0x18] sm:$0xff]  ;;  %v144_v6 = vld [vmem:[#allocation6 + $0x20] sm:$0xff]  ;;  %s856_s3 = sshll.u32 %s1270_s4, 4  ;;  %s857_s3 = int_to_ptr.vmem [resolvable:$true] %s856_s3 }
  0x5d   :  { %v157_v5 = vpack.c.bf16 %v143_v4, %v142_v2  ;;  %v145_v7 = vld [vmem:[#allocation6 + $0x28] sm:$0xff]  ;;  %v146_v8 = vld [vmem:[#allocation6 + $0x30] sm:$0xff]  ;;  %v147_v10 = vld [vmem:[#allocation6 + $0x38] sm:$0xff]  ;;  %s1231_s7 = scalar_lea.vmem %s857_s3, 2048  ;;  %p1236_p13 = scmp.lt.s32.totalorder %s857_s3, %s857_s3 }
  0x5e   :  { %975 = vmatprep.subr.bf16.mxu0 %v156_v3  ;;  %v158_v9 = vpack.c.bf16 %v145_v7, %v144_v6  ;;  %v1033_v11 = vld [vmem:[#allocation3] sm:$0xff]   ;;  %v159_v12 = vpack.c.bf16 %v147_v10, %v146_v8  ;;  %v149_v14 = vld [vmem:[#allocation6 + $0x48] sm:$0xff]  ;;  %v150_v15 = vld [vmem:[#allocation6 + $0x50] sm:$0xff]  ;;  %p1232_p12 = scmp.ne.s32.totalorder %s857_s3, %s1231_s7  ;;  %p1237_p0 = scmp.lt.s32.totalorder %s1231_s7, %s1231_s7 }
  0x5f   :  { %976 = vmatpush3.bf16.msra.mxu0 %v156_v3  ;;  %991 = vmatprep.mubr.bf16.mxu0 %v1033_v11  ;;  %v148_v13 = vld [vmem:[#allocation6 + $0x40] sm:$0xff]  ;;  %v151_v17 = vld [vmem:[#allocation6 + $0x58] sm:$0xff]  ;;  %v1043_v20 = vld [vmem:[#allocation9 + $0x48] sm:$0xff]  }
  0x60   :  { %977 = vmatprep.subr.bf16.mxu0 %v157_v5  ;;  %v160_v16 = vpack.c.bf16 %v149_v14, %v148_v13  ;;  %v1041_v18 = vld [vmem:[#allocation9 + $0x40] sm:$0xff]   ;;  %v161_v21 = vpack.c.bf16 %v151_v17, %v150_v15  ;;  %v153_v23 = vld [vmem:[#allocation6 + $0x68] sm:$0xff]  ;;  %v1045_v25 = vld [vmem:[#allocation9 + $0x50] sm:$0xff]   ;;  %p1238_p1 = por %p1237_p0, %p1236_p13 }
  0x61   :  { %v1042_v19 = vld [vmem:[#allocation9] sm:$0xff]   ;;  %1007 = vmatprep.subr.bf16.mxu1 %v1041_v18  ;;  %v1044_v24 = vld [vmem:[#allocation9 + $0x8] sm:$0xff]   ;;  %v154_v27 = vld [vmem:[#allocation6 + $0x70] sm:$0xff] }
  0x62   :  { %v152_v22 = vld [vmem:[#allocation6 + $0x60] sm:$0xff]  ;;  %1015 = vmatpush3.bf16.msra.mxu1 %v1042_v19  ;;  %v155_v28 = vld [vmem:[#allocation6 + $0x78] sm:$0xff]  ;;  %v1046_v29 = vld [vmem:[#allocation9 + $0x10] sm:$0xff]   ;;  %p1239_p2 = pnand %p1238_p1, %p1232_p12 }
  0x63   :  { %978 = vmatpush3.bf16.msra.mxu0 %v157_v5  ;;  %1008 = vmatprep.subr.bf16.mxu1 %v1043_v20  ;;  %v162_v26 = vpack.c.bf16 %v153_v23, %v152_v22  ;;  %v1047_v30 = vld [vmem:[#allocation9 + $0x58] sm:$0xff]   ;;  %v163_v31 = vpack.c.bf16 %v155_v28, %v154_v27  ;;  %v1049_v33 = vld [vmem:[#allocation9 + $0x60] sm:$0xff]   ;;  %v1034_v34 = vld [vmem:[#allocation3 + $0x8] sm:$0xff]  }
  0x64   :  { %979 = vmatprep.subr.bf16.mxu0 %v158_v9  ;;  %v1048_v32 = vld [vmem:[#allocation9 + $0x18] sm:$0xff]   ;;  %v1050_v35 = vld [vmem:[#allocation9 + $0x20] sm:$0xff]   ;;  %v1035_v36 = vld [vmem:[#allocation3 + $0x10] sm:$0xff]  }
  0x65   :  { %v1051_v37 = vld [vmem:[#allocation9 + $0x68] sm:$0xff]   ;;  %v1053_v39 = vld [vmem:[#allocation9 + $0x70] sm:$0xff]   ;;  %v1036_v40 = vld [vmem:[#allocation3 + $0x18] sm:$0xff]  }
  0x66   :  { %1016 = vmatpush3.bf16.msra.mxu1 %v1044_v24  ;;  %v1052_v38 = vld [vmem:[#allocation9 + $0x28] sm:$0xff]   ;;  %v1054_v41 = vld [vmem:[#allocation9 + $0x30] sm:$0xff]   ;;  %v1037_v42 = vld [vmem:[#allocation3 + $0x20] sm:$0xff]  }
  0x67   :  { %980 = vmatpush3.bf16.msra.mxu0 %v158_v9  ;;  %1009 = vmatprep.subr.bf16.mxu1 %v1045_v25  ;;  %v1038_v43 = vld [vmem:[#allocation3 + $0x28] sm:$0xff]   ;;  %v1039_v44 = vld [vmem:[#allocation3 + $0x30] sm:$0xff]   ;;  %v1040_v45 = vld [vmem:[#allocation3 + $0x38] sm:$0xff]  }
  0x68   :  { %981 = vmatprep.subr.bf16.mxu0 %v159_v12  ;;  %v1055_v46 = vld [vmem:[#allocation9 + $0x78] sm:$0xff]   ;;  %v360_v48 = vld [vmem:[#allocation8] sm:$0xff]  ;;  %v361_v49 = vld [vmem:[#allocation8 + $0x8] sm:$0xff] }
  0x69   :  { %v1056_v47 = vld [vmem:[#allocation9 + $0x38] sm:$0xff]   ;;  %v377_v50 = vpack.c.bf16 %v361_v49, %v360_v48  ;;  %v364_v51 = vld [vmem:[#allocation8 + $0x20] sm:$0xff]  ;;  %v365_v52 = vld [vmem:[#allocation8 + $0x28] sm:$0xff] }
  0x6a   :  { %1017 = vmatpush3.bf16.msra.mxu1 %v1046_v29  ;;  %v381_v53 = vpack.c.bf16 %v365_v52, %v364_v51  ;;  %v362_v55 = vld [vmem:[#allocation8 + $0x10] sm:$0xff]  ;;  %v363_v56 = vld [vmem:[#allocation8 + $0x18] sm:$0xff]  ;;  %v368_v9 = vld [vmem:[#allocation8 + $0x40] sm:$0xff] }
  0x6b   :  { %982 = vmatpush3.bf16.msra.mxu0 %v159_v12  ;;  %1010 = vmatprep.subr.bf16.mxu1 %v1047_v30  ;;  %v379_v61 = vpack.c.bf16 %v363_v56, %v362_v55  ;;  %v366_v0 = vld [vmem:[#allocation8 + $0x30] sm:$0xff]  ;;  %v367_v1 = vld [vmem:[#allocation8 + $0x38] sm:$0xff]  ;;  %v369_v10 = vld [vmem:[#allocation8 + $0x48] sm:$0xff] }
  0x6c   :  { %983 = vmatprep.subr.bf16.mxu0 %v160_v16  ;;  %575 = vmatprep.mubr.bf16.mxu1 %v381_v53  ;;  %v383_v6 = vpack.c.bf16 %v367_v1, %v366_v0  ;;  %v385_v15 = vpack.c.bf16 %v369_v10, %v368_v9  ;;  %v373_v27 = vld [vmem:[#allocation8 + $0x68] sm:$0xff] }
  0x6e   :  { %1018 = vmatpush3.bf16.msra.mxu1 %v1048_v32 }
  0x6f   :  { %984 = vmatpush3.bf16.msra.mxu0 %v160_v16  ;;  %1011 = vmatprep.subr.bf16.mxu1 %v1049_v33 }
  0x70   :  { %985 = vmatprep.subr.bf16.mxu0 %v161_v21 }
  0x72   :  { %1019 = vmatpush3.bf16.msra.mxu1 %v1050_v35 }
  0x73   :  { %986 = vmatpush3.bf16.msra.mxu0 %v161_v21  ;;  %1012 = vmatprep.subr.bf16.mxu1 %v1051_v37 }
  0x74   :  { %987 = vmatprep.subr.bf16.mxu0 %v162_v26 }
  0x76   :  { %1020 = vmatpush3.bf16.msra.mxu1 %v1052_v38 }
  0x77   :  { %988 = vmatpush3.bf16.msra.mxu0 %v162_v26  ;;  %1013 = vmatprep.subr.bf16.mxu1 %v1053_v39  ;;  %v372_v26 = vld [vmem:[#allocation8 + $0x60] sm:$0xff] }
  0x78   :  { %989 = vmatprep.subr.bf16.mxu0 %v163_v31  ;;  %v389_v28 = vpack.c.bf16 %v373_v27, %v372_v26 }
  0x7a   :  { %1021 = vmatpush3.bf16.msra.mxu1 %v1054_v41 }
  0x7b   :  { %990 = vmatpush3.bf16.msra.mxu0 %v163_v31  ;;  %1014 = vmatprep.subr.bf16.mxu1 %v1055_v46 }
  0x7c   :  { %911 = vmatprep.subr.bf16.mxu0 %v1041_v18  ;;  %v370_v18 = vld [vmem:[#allocation8 + $0x50] sm:$0xff] }
  0x7e   :  { %992 = vmatmul.mubr.bf16.vlgmr.msra.gmra.mrb[0].mxu0 %v1034_v34  ;;  %1022 = vmatpush3.bf16.msra.mxu1 %v1056_v47 }
  0x7f   :  { %995 = vmatprep.mubr.bf16.mxu0 %v1035_v36  ;;  %912 = vmatpush3.bf16.msra.mxu0 %v1042_v19  ;;  %v371_v19 = vld [vmem:[#allocation8 + $0x58] sm:$0xff]  ;;  %v1369_v36 = vld [vmem:[#allocation11] ss:$0 sm:$0xff] }
  0x80   :  { %913 = vmatprep.subr.bf16.mxu0 %v1043_v20  ;;  %v387_v22 = vpack.c.bf16 %v371_v19, %v370_v18 }
  0x83   :  { %914 = vmatpush3.bf16.msra.mxu0 %v1044_v24 }
  0x84   :  { %915 = vmatprep.subr.bf16.mxu0 %v1045_v25 }
  0x86   :  { %996 = vmatmul.mubr.bf16.gmra.mrb[4].mxu0 %v1036_v40 }
  0x87   :  { %999 = vmatprep.mubr.bf16.mxu0 %v1037_v42  ;;  %916 = vmatpush3.bf16.msra.mxu0 %v1046_v29  ;;  %v374_v29 = vld [vmem:[#allocation8 + $0x70] sm:$0xff] }
  0x88   :  { %917 = vmatprep.subr.bf16.mxu0 %v1047_v30  ;;  %v375_v30 = vld [vmem:[#allocation8 + $0x78] sm:$0xff] }
  0x89   :  { %v391_v31 = vpack.c.bf16 %v375_v30, %v374_v29 }
  0x8b   :  { %918 = vmatpush3.bf16.msra.mxu0 %v1048_v32  ;;  %v624_v32 = vlaneseq }
  0x8c   :  { %919 = vmatprep.subr.bf16.mxu0 %v1049_v33 }
  0x8d   :  { %v1367_v33 = vand.u32 127, %v624_v32 }
  0x8e   :  { %1000 = vmatmul.mubr.bf16.gmra.mrb[8].mxu0 %v1038_v43 }
  0x8f   :  { %1003 = vmatprep.mubr.bf16.mxu0 %v1039_v44  ;;  %920 = vmatpush3.bf16.msra.mxu0 %v1050_v35  ;;  %vm626_vm0 = vcmp.lt.s32.totalorder %v1367_v33, 8 }
  0x90   :  { %921 = vmatprep.subr.bf16.mxu0 %v1051_v37 }
  0x93   :  { %922 = vmatpush3.bf16.msra.mxu0 %v1052_v38 }
  0x94   :  { %923 = vmatprep.subr.bf16.mxu0 %v1053_v39 }
  0x96   :  { %1004 = vmatmul.mubr.bf16.gmra.mrb[12].mxu0 %v1040_v45 }
  0x97   :  { %924 = vmatpush3.bf16.msra.mxu0 %v1054_v41  ;;  %559 = vmatprep.mubr.bf16.mxu0 %v377_v50 }
  0x98   :  { %925 = vmatprep.subr.bf16.mxu0 %v1055_v46 }
  0x9b   :  { %926 = vmatpush3.bf16.msra.mxu0 %v1056_v47 }
 0x151   :  { %v993_v54 = vpop.f32.mrb[0].mxu0 }
 0x152   :  { %v246_v57 = vpop.f32.mrb[1].mxu0 }
 0x153   :  { %v994_v58 = vpop.f32.mrb[2].mxu0 }
 0x154   :  { %v378_v59 = vpack.c.bf16 %v994_v58, %v993_v54  ;;  %v249_v60 = vpop.f32.mrb[3].mxu0 }
 0x155   :  { %v376_v62 = vpack.c.bf16 %v249_v60, %v246_v57 }
 0x157   :  { %560 = vmatmul.mubr.bf16.vlgmr.msra.gmra.mrb[16].mxu0 %v376_v62 }
 0x158   :  { %567 = vmatprep.mubr.bf16.mxu0 %v379_v61 }
 0x159   :  { %v997_v63 = vpop.f32.mrb[4].mxu0 }
 0x15a   :  { %v262_v2 = vpop.f32.mrb[5].mxu0 }
 0x15b   :  { %v998_v3 = vpop.f32.mrb[6].mxu0 }
 0x15c   :  { %v382_v4 = vpack.c.bf16 %v998_v3, %v997_v63  ;;  %v265_v5 = vpop.f32.mrb[7].mxu0 }
 0x15d   :  { %v380_v7 = vpack.c.bf16 %v265_v5, %v262_v2 }
 0x15f   :  { %568 = vmatmul.mubr.bf16.gmra.mrb[20].mxu0 %v378_v59  ;;  %576 = vmatmul.mubr.bf16.vlgmr.msra.gmra.mrb[0].mxu1 %v380_v7 }
 0x160   :  { %583 = vmatprep.mubr.bf16.mxu1 %v383_v6 }
 0x161   :  { %v1001_v8 = vpop.f32.mrb[8].mxu0 }
 0x162   :  { %v278_v11 = vpop.f32.mrb[9].mxu0 }
 0x163   :  { %v1002_v12 = vpop.f32.mrb[10].mxu0 }
 0x164   :  { %v386_v13 = vpack.c.bf16 %v1002_v12, %v1001_v8  ;;  %v281_v14 = vpop.f32.mrb[11].mxu0 }
 0x165   :  { %v384_v16 = vpack.c.bf16 %v281_v14, %v278_v11 }
 0x167   :  { %584 = vmatmul.mubr.bf16.gmra.mrb[4].mxu1 %v382_v4 }
 0x168   :  { %591 = vmatprep.mubr.bf16.mxu1 %v385_v15 }
 0x169   :  { %v1005_v17 = vpop.f32.mrb[12].mxu0 }
 0x16a   :  { %v294_v20 = vpop.f32.mrb[13].mxu0 }
 0x16b   :  { %v1006_v21 = vpop.f32.mrb[14].mxu0 }
 0x16c   :  { %v390_v23 = vpack.c.bf16 %v1006_v21, %v1005_v17  ;;  %v297_v24 = vpop.f32.mrb[15].mxu0 }
 0x16d   :  { %v388_v25 = vpack.c.bf16 %v297_v24, %v294_v20 }
 0x16f   :  { %592 = vmatmul.mubr.bf16.gmra.mrb[8].mxu1 %v384_v16 }
 0x170   :  { %599 = vmatprep.mubr.bf16.mxu1 %v387_v22 }
 0x177   :  { %600 = vmatmul.mubr.bf16.gmra.mrb[12].mxu1 %v386_v13 }
 0x178   :  { %607 = vmatprep.mubr.bf16.mxu1 %v389_v28 }
 0x17f   :  { %608 = vmatmul.mubr.bf16.gmra.mrb[16].mxu1 %v388_v25 }
 0x180   :  { %615 = vmatprep.mubr.bf16.mxu1 %v391_v31 }
 0x187   :  { %616 = vmatmul.mubr.bf16.gmra.mrb[20].mxu1 %v390_v23 }
 0x22a   :  { %v927_v34 = vpop.f32.mrb[16].mxu0 }
 0x22b   :  { %v928_v35 = vpop.f32.mrb[17].mxu0 }
 0x22c   :  { %v929_v37 = vadd.f32 %v928_v35, %v927_v34  ;;  %v930_v38 = vpop.f32.mrb[18].mxu0 }
 0x22d   :  { %v931_v39 = vpop.f32.mrb[19].mxu0 }
 0x22e   :  { %v932_v40 = vadd.f32 %v931_v39, %v930_v38  ;;  %v1373_v41 = vadd.f32 %v929_v37, %v1369_v36 }
 0x230   :  { %v1378_v42 = vsel %vm626_vm0, %v1373_v41, -1e+30  ;;  %v1381_v43 = vadd.f32 %v932_v40, %v1369_v36 }
 0x231   :  { %643 = vmax.xlane.f32.xlu0 %v1378_v42 }
 0x232   :  { %v933_v44 = vpop.f32.mrb[20].mxu0  ;;  %v939_v45 = vpop.f32.mrb[0].mxu1  ;;  %v1387_v52 = vsel %vm626_vm0, %v1381_v43, -1e+30 }
 0x233   :  { %v934_v46 = vpop.f32.mrb[21].mxu0  ;;  %v940_v47 = vpop.f32.mrb[1].mxu1 }
 0x234   :  { %v935_v48 = vadd.f32 %v934_v46, %v933_v44  ;;  %v941_v49 = vadd.f32 %v940_v47, %v939_v45  ;;  %v936_v50 = vpop.f32.mrb[22].mxu0  ;;  %v942_v51 = vpop.f32.mrb[2].mxu1 }
 0x235   :  { %v937_v53 = vpop.f32.mrb[23].mxu0  ;;  %v943_v54 = vpop.f32.mrb[3].mxu1  ;;  %645 = vmax.xlane.f32.xlu0 %v1387_v52 }
 0x236   :  { %v938_v55 = vadd.f32 %v937_v53, %v936_v50  ;;  %v944_v56 = vadd.f32 %v943_v54, %v942_v51  ;;  %v1391_v57 = vadd.f32 %v935_v48, %v1369_v36  ;;  %v1394_v58 = vadd.f32 %v941_v49, %v1369_v36 }
 0x238   :  { %v1399_v59 = vsel %vm626_vm0, %v1391_v57, -1e+30  ;;  %v1404_v60 = vsel %vm626_vm0, %v1394_v58, -1e+30  ;;  %v1407_v61 = vadd.f32 %v938_v55, %v1369_v36  ;;  %v1417_v3 = vadd.f32 %v944_v56, %v1369_v36 }
 0x239   :  { %647 = vmax.xlane.f32.xlu1 %v1399_v59  ;;  %651 = vmax.xlane.f32.xlu0 %v1404_v60 }
 0x23a   :  { %v945_v62 = vpop.f32.mrb[4].mxu1  ;;  %v1414_v2 = vsel %vm626_vm0, %v1407_v61, -1e+30  ;;  %v1426_v7 = vsel %vm626_vm0, %v1417_v3, -1e+30 }
 0x23b   :  { %v946_v63 = vpop.f32.mrb[5].mxu1 }
 0x23c   :  { %v947_v0 = vadd.f32 %v946_v63, %v945_v62  ;;  %v948_v1 = vpop.f32.mrb[6].mxu1 }
 0x23d   :  { %v949_v4 = vpop.f32.mrb[7].mxu1  ;;  %649 = vmax.xlane.f32.xlu1 %v1414_v2 }
 0x23e   :  { %v950_v5 = vadd.f32 %v949_v4, %v948_v1  ;;  %v1421_v6 = vadd.f32 %v947_v0, %v1369_v36 }
 0x240   :  { %v1431_v8 = vsel %vm626_vm0, %v1421_v6, -1e+30  ;;  %v1434_v9 = vadd.f32 %v950_v5, %v1369_v36 }
 0x241   :  { %653 = vmax.xlane.f32.xlu1 %v1426_v7  ;;  %655 = vmax.xlane.f32.xlu0 %v1431_v8 }
 0x242   :  { %v951_v10 = vpop.f32.mrb[8].mxu1  ;;  %v1441_v14 = vsel %vm626_vm0, %v1434_v9, -1e+30 }
 0x243   :  { %v952_v11 = vpop.f32.mrb[9].mxu1 }
 0x244   :  { %v953_v12 = vadd.f32 %v952_v11, %v951_v10  ;;  %v954_v13 = vpop.f32.mrb[10].mxu1 }
 0x245   :  { %v955_v15 = vpop.f32.mrb[11].mxu1  ;;  %657 = vmax.xlane.f32.xlu1 %v1441_v14 }
 0x246   :  { %v956_v16 = vadd.f32 %v955_v15, %v954_v13  ;;  %v1445_v17 = vadd.f32 %v953_v12, %v1369_v36 }
 0x248   :  { %v1450_v18 = vsel %vm626_vm0, %v1445_v17, -1e+30  ;;  %v1453_v19 = vadd.f32 %v956_v16, %v1369_v36 }
 0x249   :  { %659 = vmax.xlane.f32.xlu0 %v1450_v18 }
 0x24a   :  { %v957_v20 = vpop.f32.mrb[12].mxu1  ;;  %v1459_v21 = vsel %vm626_vm0, %v1453_v19, -1e+30 }
 0x24b   :  { %v958_v22 = vpop.f32.mrb[13].mxu1  ;;  %661 = vmax.xlane.f32.xlu1 %v1459_v21 }
 0x24c   :  { %v959_v23 = vadd.f32 %v958_v22, %v957_v20  ;;  %v960_v24 = vpop.f32.mrb[14].mxu1 }
 0x24d   :  { %v961_v25 = vpop.f32.mrb[15].mxu1 }
 0x24e   :  { %v962_v26 = vadd.f32 %v961_v25, %v960_v24  ;;  %v1463_v27 = vadd.f32 %v959_v23, %v1369_v36 }
 0x250   :  { %v1468_v28 = vsel %vm626_vm0, %v1463_v27, -1e+30  ;;  %v1471_v29 = vadd.f32 %v962_v26, %v1369_v36 }
 0x251   :  { %663 = vmax.xlane.f32.xlu0 %v1468_v28 }
 0x252   :  { %v963_v30 = vpop.f32.mrb[16].mxu1  ;;  %v1477_v31 = vsel %vm626_vm0, %v1471_v29, -1e+30 }
 0x253   :  { %665 = vmax.xlane.f32.xlu1 %v1477_v31  ;;  %v964_v32 = vpop.f32.mrb[17].mxu1 }
 0x254   :  { %v965_v34 = vadd.f32 %v964_v32, %v963_v30  ;;  %v966_v35 = vpop.f32.mrb[18].mxu1 }
 0x255   :  { %v967_v37 = vpop.f32.mrb[19].mxu1 }
 0x256   :  { %v968_v38 = vadd.f32 %v967_v37, %v966_v35  ;;  %v1481_v39 = vadd.f32 %v965_v34, %v1369_v36 }
 0x258   :  { %v1486_v40 = vsel %vm626_vm0, %v1481_v39, -1e+30  ;;  %v1489_v44 = vadd.f32 %v968_v38, %v1369_v36 }
 0x259   :  { %667 = vmax.xlane.f32.xlu0 %v1486_v40 }
 0x25a   :  { %v969_v45 = vpop.f32.mrb[20].mxu1  ;;  %v1495_v46 = vsel %vm626_vm0, %v1489_v44, -1e+30 }
 0x25b   :  { %v970_v47 = vpop.f32.mrb[21].mxu1  ;;  %669 = vmax.xlane.f32.xlu1 %v1495_v46 }
 0x25c   :  { %v971_v48 = vadd.f32 %v970_v47, %v969_v45  ;;  %v972_v49 = vpop.f32.mrb[22].mxu1 }
 0x25d   :  { %v973_v50 = vpop.f32.mrb[23].mxu1 }
 0x25e   :  { %v974_v51 = vadd.f32 %v973_v50, %v972_v49  ;;  %v1499_v53 = vadd.f32 %v971_v48, %v1369_v36 }
 0x260   :  { %v1504_v54 = vsel %vm626_vm0, %v1499_v53, -1e+30  ;;  %v1507_v55 = vadd.f32 %v974_v51, %v1369_v36 }
 0x261   :  { %671 = vmax.xlane.f32.xlu0 %v1504_v54 }
 0x262   :  { %v1513_v56 = vsel %vm626_vm0, %v1507_v55, -1e+30 }
 0x263   :  { %673 = vmax.xlane.f32.xlu1 %v1513_v56 }
 0x2be   :  { %v1516_v62 = vpop.xlane.xlu0 %643 }
 0x2bf   :  { %v675_v63 = vsub.f32 %v1378_v42, %v1516_v62 }
 0x2c1   :  { %v691_v0 = vmul.f32 1.442695, %v675_v63 }
 0x2c2   :  { %v1520_v1 = vpop.xlane.xlu0 %645 }
 0x2c3   :  { %1057 = vpow2.f32 %v691_v0  ;;  %v676_v36 = vsub.f32 %v1387_v52, %v1520_v1 }
 0x2c5   :  { %v693_v4 = vmul.f32 1.442695, %v676_v36 }
 0x2c6   :  { %v1524_v5 = vpop.xlane.xlu1 %647  ;;  %v1526_v10 = vpop.xlane.xlu0 %651 }
 0x2c7   :  { %1059 = vpow2.f32 %v693_v4  ;;  %v677_v11 = vsub.f32 %v1399_v59, %v1524_v5  ;;  %v679_v12 = vsub.f32 %v1404_v60, %v1526_v10 }
 0x2c9   :  { %v695_v42 = vmul.f32 1.442695, %v677_v11  ;;  %v699_v13 = vmul.f32 1.442695, %v679_v12 }
 0x2ca   :  { %v1532_v15 = vpop.xlane.xlu1 %649 }
 0x2cb   :  { %1061 = vpow2.f32 %v695_v42  ;;  %v678_v52 = vsub.f32 %v1414_v2, %v1532_v15 }
 0x2cc   :  { %1063 = vpow2.f32 %v699_v13 }
 0x2cd   :  { %v1058_v16 = vpop.eup %1057  ;;  %v697_v20 = vmul.f32 1.442695, %v678_v52 }
 0x2ce   :  { %v1536_v22 = vpop.xlane.xlu1 %653  ;;  %v1538_v23 = vpop.xlane.xlu0 %655  ;;  %v723_v59 = vsel %vm626_vm0, %v1058_v16, 0.0 }
 0x2cf   :  { %1065 = vpow2.f32 %v697_v20  ;;  %v680_v60 = vsub.f32 %v1426_v7, %v1536_v22  ;;  %v681_v24 = vsub.f32 %v1431_v8, %v1538_v23  ;;  %739 = vadd.xlane.f32.xlu0 %v723_v59 }
 0x2d1   :  { %v1060_v25 = vpop.eup %1059  ;;  %v701_v2 = vmul.f32 1.442695, %v680_v60  ;;  %v703_v26 = vmul.f32 1.442695, %v681_v24 }
 0x2d2   :  { %v1546_v30 = vpop.xlane.xlu1 %657  ;;  %v724_v32 = vsel %vm626_vm0, %v1060_v25, 0.0 }
 0x2d3   :  { %1067 = vpow2.f32 %v701_v2  ;;  %v682_v34 = vsub.f32 %v1441_v14, %v1546_v30  ;;  %741 = vadd.xlane.f32.xlu1 %v724_v32 }
 0x2d4   :  { %1069 = vpow2.f32 %v703_v26 }
 0x2d5   :  { %v1062_v35 = vpop.eup %1061  ;;  %v705_v7 = vmul.f32 1.442695, %v682_v34 }
 0x2d6   :  { %v1552_v37 = vpop.xlane.xlu0 %659  ;;  %v725_v8 = vsel %vm626_vm0, %v1062_v35, 0.0  ;;  %v1064_v38 = vpop.eup %1063 }
 0x2d7   :  { %1071 = vpow2.f32 %v705_v7  ;;  %v683_v45 = vsub.f32 %v1450_v18, %v1552_v37  ;;  %743 = vadd.xlane.f32.xlu0 %v725_v8  ;;  %v727_v51 = vsel %vm626_vm0, %v1064_v38, 0.0 }
 0x2d8   :  { %v1558_v47 = vpop.xlane.xlu1 %661 }
 0x2d9   :  { %v1066_v48 = vpop.eup %1065  ;;  %v707_v49 = vmul.f32 1.442695, %v683_v45  ;;  %v684_v14 = vsub.f32 %v1459_v21, %v1558_v47 }
 0x2da   :  { %v726_v50 = vsel %vm626_vm0, %v1066_v48, 0.0 }
 0x2db   :  { %1073 = vpow2.f32 %v707_v49  ;;  %v709_v63 = vmul.f32 1.442695, %v684_v14  ;;  %745 = vadd.xlane.f32.xlu1 %v726_v50  ;;  %747 = vadd.xlane.f32.xlu0 %v727_v51 }
 0x2dd   :  { %v1068_v0 = vpop.eup %1067  ;;  %1075 = vpow2.f32 %v709_v63 }
 0x2de   :  { %v1070_v18 = vpop.eup %1069  ;;  %v1566_v36 = vpop.xlane.xlu0 %663  ;;  %v728_v4 = vsel %vm626_vm0, %v1068_v0, 0.0 }
 0x2df   :  { %v685_v21 = vsub.f32 %v1468_v28, %v1566_v36  ;;  %749 = vadd.xlane.f32.xlu1 %v728_v4  ;;  %v729_v11 = vsel %vm626_vm0, %v1070_v18, 0.0 }
 0x2e0   :  { %751 = vadd.xlane.f32.xlu0 %v729_v11  ;;  %v1574_v12 = vpop.xlane.xlu1 %665 }
 0x2e1   :  { %v1072_v42 = vpop.eup %1071  ;;  %v711_v13 = vmul.f32 1.442695, %v685_v21  ;;  %v686_v52 = vsub.f32 %v1477_v31, %v1574_v12 }
 0x2e2   :  { %v730_v16 = vsel %vm626_vm0, %v1072_v42, 0.0 }
 0x2e3   :  { %1077 = vpow2.f32 %v711_v13  ;;  %v713_v20 = vmul.f32 1.442695, %v686_v52  ;;  %753 = vadd.xlane.f32.xlu1 %v730_v16 }
 0x2e5   :  { %v1074_v59 = vpop.eup %1073  ;;  %1079 = vpow2.f32 %v713_v20 }
 0x2e6   :  { %v1580_v28 = vpop.xlane.xlu0 %667  ;;  %v731_v60 = vsel %vm626_vm0, %v1074_v59, 0.0 }
 0x2e7   :  { %v1076_v24 = vpop.eup %1075  ;;  %v687_v25 = vsub.f32 %v1486_v40, %v1580_v28  ;;  %755 = vadd.xlane.f32.xlu0 %v731_v60 }
 0x2e8   :  { %v1586_v2 = vpop.xlane.xlu1 %669  ;;  %v732_v31 = vsel %vm626_vm0, %v1076_v24, 0.0 }
 0x2e9   :  { %v715_v26 = vmul.f32 1.442695, %v687_v25  ;;  %v688_v32 = vsub.f32 %v1495_v46, %v1586_v2  ;;  %757 = vadd.xlane.f32.xlu1 %v732_v31 }
 0x2eb   :  { %1081 = vpow2.f32 %v715_v26  ;;  %v717_v34 = vmul.f32 1.442695, %v688_v32 }
 0x2ed   :  { %v1078_v35 = vpop.eup %1077  ;;  %1083 = vpow2.f32 %v717_v34 }
 0x2ee   :  { %v1592_v7 = vpop.xlane.xlu0 %671  ;;  %v733_v40 = vsel %vm626_vm0, %v1078_v35, 0.0 }
 0x2ef   :  { %v1080_v8 = vpop.eup %1079  ;;  %v689_v38 = vsub.f32 %v1504_v54, %v1592_v7  ;;  %759 = vadd.xlane.f32.xlu0 %v733_v40 }
 0x2f0   :  { %v1598_v45 = vpop.xlane.xlu1 %673  ;;  %v734_v46 = vsel %vm626_vm0, %v1080_v8, 0.0 }
 0x2f1   :  { %v719_v48 = vmul.f32 1.442695, %v689_v38  ;;  %v690_v49 = vsub.f32 %v1513_v56, %v1598_v45  ;;  %761 = vadd.xlane.f32.xlu1 %v734_v46 }
 0x2f3   :  { %1085 = vpow2.f32 %v719_v48  ;;  %v721_v14 = vmul.f32 1.442695, %v690_v49 }
 0x2f5   :  { %v1082_v50 = vpop.eup %1081  ;;  %1087 = vpow2.f32 %v721_v14 }
 0x2f6   :  { %v735_v51 = vsel %vm626_vm0, %v1082_v50, 0.0 }
 0x2f7   :  { %v1084_v63 = vpop.eup %1083  ;;  %763 = vadd.xlane.f32.xlu0 %v735_v51 }
 0x2f8   :  { %v736_v54 = vsel %vm626_vm0, %v1084_v63, 0.0 }
 0x2f9   :  { %765 = vadd.xlane.f32.xlu1 %v736_v54 }
 0x2fd   :  { %v1086_v0 = vpop.eup %1085 }
 0x2fe   :  { %v737_v18 = vsel %vm626_vm0, %v1086_v0, 0.0 }
 0x2ff   :  { %v1088_v4 = vpop.eup %1087  ;;  %767 = vadd.xlane.f32.xlu0 %v737_v18 }
 0x300   :  { %v738_v56 = vsel %vm626_vm0, %v1088_v4, 0.0 }
 0x301   :  { %769 = vadd.xlane.f32.xlu1 %v738_v56 }
 0x35c   :  { %v740_v21 = vpop.xlane.xlu0 %739 }
 0x35d   :  { %1089 = vlog2.f32 %v740_v21 }
 0x360   :  { %v742_v11 = vpop.xlane.xlu1 %741 }
 0x361   :  { %1091 = vlog2.f32 %v742_v11 }
 0x364   :  { %v744_v42 = vpop.xlane.xlu0 %743 }
 0x365   :  { %1093 = vlog2.f32 %v744_v42 }
 0x367   :  { %v1090_v13 = vpop.eup %1089 }
 0x368   :  { %v772_v52 = vmul.f32 0.6931472, %v1090_v13  ;;  %v746_v16 = vpop.xlane.xlu1 %745  ;;  %v748_v20 = vpop.xlane.xlu0 %747 }
 0x369   :  { %1095 = vlog2.f32 %v746_v16 }
 0x36a   :  { %v803_v59 = vadd.f32 %v772_v52, %v1516_v62  ;;  %1097 = vlog2.f32 %v748_v20 }
 0x36b   :  { %v1092_v60 = vpop.eup %1091 }
 0x36c   :  { %v819_v24 = vsub.f32 %v1373_v41, %v803_v59  ;;  %v774_v33 = vmul.f32 0.6931472, %v1092_v60  ;;  %v750_v25 = vpop.xlane.xlu1 %749 }
 0x36d   :  { %1099 = vlog2.f32 %v750_v25  ;;  %v752_v31 = vpop.xlane.xlu0 %751 }
 0x36e   :  { %835 = vst [vmem:[#allocation12] sm:$0xff] %v819_v24  ;;  %v804_v26 = vadd.f32 %v774_v33, %v1520_v1  ;;  %1101 = vlog2.f32 %v752_v31 }
 0x36f   :  { %v1094_v32 = vpop.eup %1093 }
 0x370   :  { %v820_v34 = vsub.f32 %v1381_v43, %v804_v26  ;;  %v776_v35 = vmul.f32 0.6931472, %v1094_v32  ;;  %v754_v40 = vpop.xlane.xlu1 %753 }
 0x371   :  { %1103 = vlog2.f32 %v754_v40 }
 0x372   :  { %836 = vst [vmem:[#allocation12 + $0x8] sm:$0xff] %v820_v34  ;;  %v805_v62 = vadd.f32 %v776_v35, %v1524_v5 }
 0x373   :  { %v1096_v8 = vpop.eup %1095 }
 0x374   :  { %v1098_v38 = vpop.eup %1097  ;;  %v821_v41 = vsub.f32 %v1391_v57, %v805_v62  ;;  %v778_v46 = vmul.f32 0.6931472, %v1096_v8  ;;  %v756_v48 = vpop.xlane.xlu0 %755 }
 0x375   :  { %v780_v49 = vmul.f32 0.6931472, %v1098_v38  ;;  %1105 = vlog2.f32 %v756_v48 }
 0x376   :  { %837 = vst [vmem:[#allocation12 + $0x10] sm:$0xff] %v821_v41  ;;  %v806_v1 = vadd.f32 %v778_v46, %v1532_v15  ;;  %v758_v14 = vpop.xlane.xlu1 %757 }
 0x377   :  { %v1100_v50 = vpop.eup %1099  ;;  %v807_v43 = vadd.f32 %v780_v49, %v1526_v10  ;;  %1107 = vlog2.f32 %v758_v14 }
 0x378   :  { %v1102_v51 = vpop.eup %1101  ;;  %v822_v63 = vsub.f32 %v1407_v61, %v806_v1  ;;  %v782_v5 = vmul.f32 0.6931472, %v1100_v50 }
 0x379   :  { %v823_v54 = vsub.f32 %v1394_v58, %v807_v43  ;;  %v784_v0 = vmul.f32 0.6931472, %v1102_v51 }
 0x37a   :  { %838 = vst [vmem:[#allocation12 + $0x18] sm:$0xff] %v822_v63  ;;  %v808_v57 = vadd.f32 %v782_v5, %v1536_v22 }
 0x37b   :  { %v1104_v18 = vpop.eup %1103  ;;  %839 = vst [vmem:[#allocation12 + $0x20] sm:$0xff] %v823_v54  ;;  %v809_v4 = vadd.f32 %v784_v0, %v1538_v23 }
 0x37c   :  { %v824_v15 = vsub.f32 %v1417_v3, %v808_v57  ;;  %v786_v56 = vmul.f32 0.6931472, %v1104_v18  ;;  %v760_v21 = vpop.xlane.xlu0 %759 }
 0x37d   :  { %v825_v10 = vsub.f32 %v1421_v6, %v809_v4  ;;  %1109 = vlog2.f32 %v760_v21 }
 0x37e   :  { %840 = vst [vmem:[#allocation12 + $0x28] sm:$0xff] %v824_v15  ;;  %v810_v61 = vadd.f32 %v786_v56, %v1546_v30  ;;  %v762_v11 = vpop.xlane.xlu1 %761 }
 0x37f   :  { %v1106_v58 = vpop.eup %1105  ;;  %841 = vst [vmem:[#allocation12 + $0x30] sm:$0xff] %v825_v10  ;;  %1111 = vlog2.f32 %v762_v11 }
 0x380   :  { %v826_v22 = vsub.f32 %v1434_v9, %v810_v61  ;;  %v788_v42 = vmul.f32 0.6931472, %v1106_v58 }
 0x381   :  { %v1108_v13 = vpop.eup %1107 }
 0x382   :  { %842 = vst [vmem:[#allocation12 + $0x38] sm:$0xff] %v826_v22  ;;  %v811_v23 = vadd.f32 %v788_v42, %v1552_v37  ;;  %v790_v3 = vmul.f32 0.6931472, %v1108_v13 }
 0x384   :  { %v827_v52 = vsub.f32 %v1445_v17, %v811_v23  ;;  %v812_v6 = vadd.f32 %v790_v3, %v1558_v47  ;;  %v764_v16 = vpop.xlane.xlu0 %763 }
 0x385   :  { %1113 = vlog2.f32 %v764_v16 }
 0x386   :  { %843 = vst [vmem:[#allocation12 + $0x40] sm:$0xff] %v827_v52  ;;  %v828_v30 = vsub.f32 %v1453_v19, %v812_v6  ;;  %v766_v20 = vpop.xlane.xlu1 %765 }
 0x387   :  { %v1110_v59 = vpop.eup %1109  ;;  %1115 = vlog2.f32 %v766_v20 }
 0x388   :  { %844 = vst [vmem:[#allocation12 + $0x48] sm:$0xff] %v828_v30  ;;  %v792_v9 = vmul.f32 0.6931472, %v1110_v59 }
 0x389   :  { %v1112_v60 = vpop.eup %1111 }
 0x38a   :  { %v813_v24 = vadd.f32 %v792_v9, %v1566_v36  ;;  %v794_v33 = vmul.f32 0.6931472, %v1112_v60 }
 0x38c   :  { %v829_v37 = vsub.f32 %v1463_v27, %v813_v24  ;;  %v814_v17 = vadd.f32 %v794_v33, %v1574_v12  ;;  %v768_v25 = vpop.xlane.xlu0 %767 }
 0x38d   :  { %1117 = vlog2.f32 %v768_v25 }
 0x38e   :  { %845 = vst [vmem:[#allocation12 + $0x50] sm:$0xff] %v829_v37  ;;  %v830_v47 = vsub.f32 %v1471_v29, %v814_v17  ;;  %v770_v31 = vpop.xlane.xlu1 %769 }
 0x38f   :  { %v1114_v19 = vpop.eup %1113  ;;  %1119 = vlog2.f32 %v770_v31 }
 0x390   :  { %846 = vst [vmem:[#allocation12 + $0x58] sm:$0xff] %v830_v47  ;;  %v796_v26 = vmul.f32 0.6931472, %v1114_v19 }
 0x391   :  { %v1116_v32 = vpop.eup %1115 }
 0x392   :  { %v815_v34 = vadd.f32 %v796_v26, %v1580_v28  ;;  %v798_v35 = vmul.f32 0.6931472, %v1116_v32 }
 0x394   :  { %v831_v36 = vsub.f32 %v1481_v39, %v815_v34  ;;  %v816_v27 = vadd.f32 %v798_v35, %v1586_v2 }
 0x396   :  { %847 = vst [vmem:[#allocation12 + $0x60] sm:$0xff] %v831_v36  ;;  %v832_v12 = vsub.f32 %v1489_v44, %v816_v27 }
 0x397   :  { %v1118_v40 = vpop.eup %1117 }
 0x398   :  { %848 = vst [vmem:[#allocation12 + $0x68] sm:$0xff] %v832_v12  ;;  %v800_v62 = vmul.f32 0.6931472, %v1118_v40 }
 0x399   :  { %v1120_v29 = vpop.eup %1119 }
 0x39a   :  { %v817_v8 = vadd.f32 %v800_v62, %v1592_v7  ;;  %v802_v38 = vmul.f32 0.6931472, %v1120_v29 }
 0x39c   :  { %v833_v41 = vsub.f32 %v1499_v53, %v817_v8  ;;  %v818_v28 = vadd.f32 %v802_v38, %v1598_v45 }
 0x39e   :  { %849 = vst [vmem:[#allocation12 + $0x70] sm:$0xff] %v833_v41  ;;  %v834_v39 = vsub.f32 %v1507_v55, %v818_v28 }
 0x3a0   :  { %850 = vst [vmem:[#allocation12 + $0x78] sm:$0xff] %v834_v39 }
 0x3a1   :  { %1242 = shalt.err (!%p1239_p2)
}
 0x3a2   :  { %s1243_s11 = scalar_lea.hbm %s1664_s5, 2048 }
 0x3a3   :  { %p1244_p3 = scmp.ne.s32.totalorder %s1664_s5, %s1243_s11  ;;  %p1247_p4 = scmp.lt.u32.totalorder %s1243_s11, %s1664_s5 }
 0x3a5   :  { %p1249_p5 = pnand %p1247_p4, %p1244_p3 }
 0x3a7   :  { %1252 = shalt.err (!%p1249_p5)
}
 0x3a8   :  { %862 = dma.vmem_to_hbm [thread:$0]  %s857_s3, 2048, %s1664_s5, [#allocation5], %s1262_s28, %s1262_s28, %s1263_s29  }
 0x3a9   :  { %1259 = dma.done.wait [#allocation5], 2048  }
 0x3aa   :  { %1260 = vsyncadd [#allocation5], 4294965248 }
 0x3ab   :  { %866 = vsyncpa [#allocation4], 1 }
 0x3ac   :  { %867 = vsyncpa [#allocation7], 1 }
 0x3ad   :  { %868 = vsyncpa [#allocation10], 1 }
 0x3ae   :  { %869 = vsyncpa [#allocation5], 1 }

</bundles_post_ra>
